<compile_context>
chip_gen: v7x
topology: tpu7x:2x2x1
jax: 0.10.0
libtpu: 0.0.40
codegen_flags: <defaults>
</compile_context>

<pallas_src>
import functools
import math

import jax
import jax.numpy as jnp
from jax import lax
from jax.experimental import pallas as pl
from jax.experimental.pallas import tpu as pltpu

_MAX_UNROLL_ITERS = 64     # cap on the in-kernel sub-dot loop length
_TOKEN_TILE_PREF = 256     # MXU M pass on v6e/v7x


def _round_up(a, b):
    return ((a + b - 1) // b) * b


def _budgets():
    """Generation-aware VMEM budgets (detected via physical VMEM size)."""
    vmem_cap = 128 << 20
    try:
        vmem_cap = int(getattr(pltpu.get_tpu_info(), "vmem_capacity_bytes", vmem_cap))
    except Exception:
        pass
    if vmem_cap <= (64 << 20):
        # v7x-class: 64 MiB physical -> leave headroom for Mosaic internal scratch.
        return dict(vmem_limit=52 << 20, weight_budget=12 << 20,
                    token_tile=_TOKEN_TILE_PREF)
    # v5e / v6e: 128 MiB physical.
    return dict(vmem_limit=100 << 20, weight_budget=28 << 20,
                token_tile=_TOKEN_TILE_PREF)


def _choose_out_chunk(out_f, cap=256):
    """Largest divisor of out_f that is a multiple of 128 and <= cap; otherwise the
    full out_f (keeps every BlockSpec last dim either 128-aligned or full-extent)."""
    for c in range(min(cap, out_f), 0, -1):
        if out_f % c == 0 and c % 128 == 0:
            return c
    return out_f


def _choose_in_superblock(in_f, C, weight_bytes, weight_budget,
                          max_iters=_MAX_UNROLL_ITERS):
    """Largest SB dividing in_f s.t. the double-buffered (in, SB*C) Ww block fits the
    weight budget, SB*C is lane-legal and the unrolled loop stays bounded.  Never
    falls back to the full extent unless it is the only legal choice."""
    G = 128 // C if (C < 128 and 128 % C == 0) else 1
    align = max(128 // math.gcd(C, 128), G)
    best = None
    for sb in range(align, in_f + 1, align):
        if in_f % sb:
            continue
        if sb // G > max_iters:
            continue
        if 2 * in_f * sb * C * weight_bytes > weight_budget:
            continue
        best = sb
    if best is None:
        # smallest lane-legal divisor, regardless of budget / unroll caps
        for sb in range(align, in_f + 1, align):
            if in_f % sb == 0:
                best = sb
                break
    if best is None:
        best = in_f     # last resort (only legal when the chunk covers all columns)
    return best, G


def _choose_token_tile(n_tok, in_f, SB, C, G, w_bytes, x_bytes, out_bytes,
                       preferred, vmem_limit):
    T = min(preferred, _round_up(max(n_tok, 1), 8))
    weight_blocks = 2 * (in_f * SB * C * w_bytes + SB * C * 4)
    while T > 8:
        per_tile = (2 * T * in_f * x_bytes        # x tile (double-buffered)
                    + 2 * T * SB * x_bytes        # xi tile
                    + 2 * T * C * 4               # b_ln tile (f32)
                    + 2 * T * C * out_bytes       # output tile
                    + 3 * T * G * C * 4           # f32 accumulators
                    + 2 * T * G * C * 4)          # in-flight w_g / temporaries
        if weight_blocks + per_tile <= int(0.7 * vmem_limit):
            break
        T = max(8, _round_up(T // 2, 8))
    return max(8, T)


def _meta_linear_kernel(x_ref, xi_ref, wwT_ref, bw_ref, bln_ref, out_ref, *acc_refs,
                        in_features, C, G, SB, n_super, eps):
    ks = pl.program_id(2)
    T = x_ref.shape[0]
    GC = G * C
    n_iters = SB // G

    x = x_ref[...]                                   # (T, in) caller dtype
    x_mxu = x.astype(wwT_ref.dtype)                  # bf16 MXU feed when packed bf16

    # Lane-dense x-weighting for C < 128: replicate each of the G x-columns across its
    # C-lane group with a tiny MXU dot (no cross-lane repeat / retile).  Built once.
    if G > 1:
        g_idx = lax.broadcasted_iota(jnp.int32, (G, GC), 0)
        m_idx = lax.broadcasted_iota(jnp.int32, (G, GC), 1)
        rep = (m_idx // C == g_idx).astype(jnp.float32)

    if n_super > 1:
        sum_w_ref, sum_sq_ref, y_raw_ref = acc_refs

        @pl.when(ks == 0)
        def _():
            sum_w_ref[...] = jnp.zeros_like(sum_w_ref)
            sum_sq_ref[...] = jnp.zeros_like(sum_sq_ref)
            y_raw_ref[...] = jnp.zeros_like(y_raw_ref)

        s_w = sum_w_ref[...]
        s_sq = sum_sq_ref[...]
        s_yr = y_raw_ref[...]
    else:
        s_w = jnp.zeros((T, GC), jnp.float32)
        s_sq = jnp.zeros((T, GC), jnp.float32)
        s_yr = jnp.zeros((T, GC), jnp.float32)

    # Single fused pass over this superblock's generated weights: sub-dot (MXU, f32
    # accumulation), bias add, E[w] / E[w^2] / x-weighted accumulation.  The (T,in,C)
    # tensor is never materialized, never reshaped and never re-read.
    for j in range(n_iters):
        c0 = j * GC
        w_g = jnp.dot(x_mxu, wwT_ref[:, c0:c0 + GC],
                      preferred_element_type=jnp.float32)          # (T, G*C)
        w_g = w_g + bw_ref[0:1, c0:c0 + GC]                         # bw packed f32
        xi = xi_ref[0, :, j * G:(j + 1) * G].astype(jnp.float32)    # (T, G)
        if G > 1:
            xw = jnp.dot(xi, rep, preferred_element_type=jnp.float32)  # (T, G*C)
        else:
            xw = xi                                                 # (T,1) lane bcast
        s_w = s_w + w_g
        s_sq = s_sq + w_g * w_g
        s_yr = s_yr + w_g * xw

    if n_super > 1:
        @pl.when(ks < n_super - 1)
        def _():
            sum_w_ref[...] = s_w
            sum_sq_ref[...] = s_sq
            y_raw_ref[...] = s_yr

    @pl.when(ks == n_super - 1)
    def _():
        if G > 1:
            sw, ssq, syr = s_w[:, 0:C], s_sq[:, 0:C], s_yr[:, 0:C]
            for g in range(1, G):
                sw = sw + s_w[:, g * C:(g + 1) * C]
                ssq = ssq + s_sq[:, g * C:(g + 1) * C]
                syr = syr + s_yr[:, g * C:(g + 1) * C]
        else:
            sw, ssq, syr = s_w, s_sq, s_yr
        inv_n = 1.0 / in_features
        mu = sw * inv_n                                             # exact E_i[w]
        var = jnp.maximum(ssq * inv_n - mu * mu, 0.0)               # one-pass var, f32
        sum_x = jnp.sum(x.astype(jnp.float32), axis=1, keepdims=True)
        # folded LayerNorm + per-token mat-vec:
        #   y = (sum_i w*x - mu * sum_i x) * rsqrt(var + eps) + b_ln
        y = (syr - mu * sum_x) * lax.rsqrt(var + eps) + bln_ref[...]
        # TODO(synk): for out_features < 128 the final store is a partial-lane vst;
        # packing several token rows per lane row would make it lane-dense.
        out_ref[...] = y.astype(out_ref.dtype)


def pack_meta_linear_params(ww, bw, wb, bb, *, mxu_dtype=None, budgets=None):
    """One-time parameter re-layout (hoisted out of the forward pass).

    ww: (in*out, in)   row f = o*in + i, w[t,o,i] = x[t] @ ww[f] + bw[f]
    bw: (in*out,)      wb: (out, in)      bb: (out,)
    """
    bud = dict(budgets or _budgets())
    in_f = ww.shape[1]
    out_f = bb.shape[0]
    assert ww.shape == (in_f * out_f, in_f)
    assert bw.shape == (in_f * out_f,)
    assert wb.shape == (out_f, in_f)

    w_dtype = jnp.dtype(mxu_dtype) if mxu_dtype is not None else jnp.dtype(ww.dtype)
    C = _choose_out_chunk(out_f)
    SB, G = _choose_in_superblock(in_f, C, w_dtype.itemsize, bud["weight_budget"])
    n_chunks = out_f // C
    n_super = in_f // SB

    # Ww^T columns ordered (chunk, superblock, i_local, o_local): each grid step's
    # (in, SB*C) block is contiguous and the kernel's sub-dots are static lane slices.
    w5 = ww.reshape(n_chunks, C, n_super, SB, in_f)            # (jc, ol, ks, il, k)
    wwT = jnp.transpose(w5, (4, 0, 2, 3, 1)).reshape(in_f, n_chunks * n_super * SB * C)
    wwT = wwT.astype(w_dtype)
    bw_p = bw.reshape(n_chunks, C, n_super, SB)
    bw_p = jnp.transpose(bw_p, (0, 2, 3, 1)).reshape(1, -1).astype(jnp.float32)

    return dict(in_features=in_f, out_features=out_f, C=C, SB=SB, G=G,
                n_chunks=n_chunks, n_super=n_super,
                wwT=wwT, bw=bw_p,
                wbT=wb.T.astype(jnp.float32),
                bb=bb.astype(jnp.float32).reshape(1, out_f),
                budgets=bud)


def meta_linear(x, packed, *, eps=1e-5):
    """x: (B, S, in) -> (B, S, out), using parameters packed by pack_meta_linear_params."""
    B, S, in_f = x.shape
    assert in_f == packed["in_features"]
    out_f = packed["out_features"]
    C, SB, G = packed["C"], packed["SB"], packed["G"]
    n_chunks, n_super = packed["n_chunks"], packed["n_super"]
    bud = packed["budgets"]

    n_tok = B * S
    x2 = x.reshape(n_tok, in_f)

    w_bytes = packed["wwT"].dtype.itemsize
    x_bytes = x.dtype.itemsize
    T = _choose_token_tile(n_tok, in_f, SB, C, G, w_bytes, x_bytes, x.dtype.itemsize,
                           bud["token_tile"], bud["vmem_limit"])
    n_tok_p = _round_up(max(n_tok, T), T)
    if n_tok_p != n_tok:
        x2 = jnp.pad(x2, ((0, n_tok_p - n_tok), (0, 0)))
    n_tiles = n_tok_p // T

    # ---- bias branch hoisted out of the kernel (plain XLA, once per call) ----------
    bf = jnp.dot(x2.astype(jnp.float32), packed["wbT"]) + packed["bb"]   # (ntok_p, out)
    mu_b = jnp.mean(bf, axis=1, keepdims=True)
    var_b = jnp.mean(jnp.square(bf - mu_b), axis=1, keepdims=True)
    b_ln = (bf - mu_b) * lax.rsqrt(var_b + eps)                           # f32

    # x restacked per in-feature superblock so the kernel's per-i slices are static
    # and every BlockSpec last dim is full-extent / 128-aligned.
    xi = x2.reshape(n_tok_p, n_super, SB).transpose(1, 0, 2)              # (ns, ntok_p, SB)

    GC = G * C
    kernel = functools.partial(_meta_linear_kernel, in_features=in_f, C=C, G=G,
                               SB=SB, n_super=n_super, eps=eps)
    scratch = [pltpu.VMEM((T, GC), jnp.float32)] * 3 if n_super > 1 else []

    out2 = pl.pallas_call(
        kernel,
        out_shape=jax.ShapeDtypeStruct((n_tok_p, out_f), x.dtype),
        grid_spec=pltpu.PrefetchScalarGridSpec(
            num_scalar_prefetch=0,
            # chunk axis OUTER (big Ww operand changes least often), token tiles in the
            # middle, in-feature superblock (reduction) INNERMOST.
            grid=(n_chunks, n_tiles, n_super),
            in_specs=[
                pl.BlockSpec((T, in_f), lambda jc, it, ks: (it, 0)),                  # x tile
                pl.BlockSpec((1, T, SB), lambda jc, it, ks: (ks, it, 0)),             # x superblock slice
                pl.BlockSpec((in_f, SB * C),
                             lambda jc, it, ks, n=n_super: (0, jc * n + ks)),         # Ww^T block
                pl.BlockSpec((1, SB * C),
                             lambda jc, it, ks, n=n_super: (0, jc * n + ks)),         # bw block (f32)
                pl.BlockSpec((T, C), lambda jc, it, ks: (it, jc)),                    # b_ln block (f32)
            ],
            out_specs=pl.BlockSpec((T, C), lambda jc, it, ks: (it, jc)),
            scratch_shapes=scratch,
        ),
        compiler_params=pltpu.CompilerParams(
            # TODO(synk): on v7x, CORE_PARALLEL on the chunk axis would give each
            # TensorCore disjoint Ww traffic; kept portable "parallel" here.
            dimension_semantics=("parallel", "parallel", "arbitrary"),
            vmem_limit_bytes=bud["vmem_limit"]),
    )(x2, xi, packed["wwT"], packed["bw"], b_ln)

    return out2[:n_tok].reshape(B, S, out_f)


def mlp_block(x, packed1, packed2):
    """MlpBlock.forward: MetaLinear(dim->hidden) then MetaLinear(hidden->dim)."""
    h = meta_linear(x, packed1)
    return meta_linear(h, packed2)


# ----------------------------- pure-JAX reference -----------------------------
def meta_linear_ref(x, ww, bw, wb, bb, eps=1e-5):
    B, S, D = x.shape
    out_features = bb.shape[0]
    x2 = x.reshape(B * S, D).astype(jnp.float32)
    w = x2 @ ww.astype(jnp.float32).T + bw.astype(jnp.float32)
    w = w.reshape(B * S, out_features, D)
    mu = w.mean(-1, keepdims=True)
    var = ((w - mu) ** 2).mean(-1, keepdims=True)
    w = (w - mu) / jnp.sqrt(var + eps)
    b = x2 @ wb.astype(jnp.float32).T + bb.astype(jnp.float32)
    mu_b = b.mean(-1, keepdims=True)
    var_b = ((b - mu_b) ** 2).mean(-1, keepdims=True)
    b = (b - mu_b) / jnp.sqrt(var_b + eps)
    y = jnp.einsum("noi,ni->no", w, x2) + b
    return y.reshape(B, S, out_features).astype(x.dtype)


def mlp_block_ref(x, params1, params2):
    h = meta_linear_ref(x, *params1)
    return meta_linear_ref(h, *params2)


if __name__ == "__main__":
    # MlpBlock(dim, config): hidden = expansion_factor * dim.
    batch, seq = 2, 8
    dim, expansion_factor = 32, 4
    hidden = expansion_factor * dim                      # 128

    key = jax.random.PRNGKey(0)
    kx, *kp = jax.random.split(key, 9)
    x = jax.random.normal(kx, (batch, seq, dim), dtype=jnp.float32)

    def init_meta_linear(keys, in_f, out_f):
        bound = 1.0 / (in_f ** 0.5)                      # nn.Linear default init
        k1, k2, k3, k4 = keys
        ww = jax.random.uniform(k1, (in_f * out_f, in_f), minval=-bound, maxval=bound)
        bw = jax.random.uniform(k2, (in_f * out_f,), minval=-bound, maxval=bound)
        wb = jax.random.uniform(k3, (out_f, in_f), minval=-bound, maxval=bound)
        bb = jax.random.uniform(k4, (out_f,), minval=-bound, maxval=bound)
        return ww, bw, wb, bb

    p1 = init_meta_linear(kp[0:4], dim, hidden)          # MetaLinear(dim -> hidden)
    p2 = init_meta_linear(kp[4:8], hidden, dim)          # MetaLinear(hidden -> dim)

    # One-time parameter packing (hoisted out of the forward path and reused).
    packed1 = pack_meta_linear_params(*p1)
    packed2 = pack_meta_linear_params(*p2)

    y = jax.block_until_ready(mlp_block(x, packed1, packed2))
    y_ref = mlp_block_ref(x, p1, p2)
    assert y.shape == (batch, seq, dim)
    err = float(jnp.max(jnp.abs(y.astype(jnp.float32) - y_ref.astype(jnp.float32))))
    assert err < 1e-3, err

    # bf16 MXU-feed path: weights packed bf16, LN / statistics math stays f32.
    xb = x.astype(jnp.bfloat16)
    packed1b = pack_meta_linear_params(*p1, mxu_dtype=jnp.bfloat16)
    packed2b = pack_meta_linear_params(*p2, mxu_dtype=jnp.bfloat16)
    yb = jax.block_until_ready(mlp_block(xb, packed1b, packed2b))
    assert yb.shape == (batch, seq, dim)
    assert bool(jnp.all(jnp.isfinite(yb.astype(jnp.float32))))

    print("KERNEL_OK")
</pallas_src>

<mosaic_0001>
module attributes {stable_mosaic.version = 11 : i64} {
  func.func @_meta_linear_kernel(%arg0: i32, %arg1: i32, %arg2: i32, %arg3: memref<16x32xf32, #tpu.memory_space<vmem>>, %arg4: memref<1x16x32xf32, #tpu.memory_space<vmem>>, %arg5: memref<32x4096xf32, #tpu.memory_space<vmem>>, %arg6: memref<1x4096xf32, #tpu.memory_space<vmem>>, %arg7: memref<16x128xf32, #tpu.memory_space<vmem>>, %arg8: memref<16x128xf32, #tpu.memory_space<vmem>>) attributes {dimension_semantics = [#tpu.dimension_semantics<parallel>, #tpu.dimension_semantics<parallel>, #tpu.dimension_semantics<arbitrary>], iteration_bounds = array<i64: 1, 1, 1>, scalar_prefetch = 0 : i64, scratch_operands = 0 : i64, tpu.core_type = #tpu.core_type<tc>, window_params = [{transform_indices = @transform_0, window_bounds = array<i64: 16, 32>}, {transform_indices = @transform_1, window_bounds = array<i64: 1, 16, 32>}, {transform_indices = @transform_2, window_bounds = array<i64: 32, 4096>}, {transform_indices = @transform_3, window_bounds = array<i64: 1, 4096>}, {transform_indices = @transform_4, window_bounds = array<i64: 16, 128>}, {transform_indices = @transform_5, window_bounds = array<i64: 16, 128>}]} {
    %c0 = arith.constant 0 : index
    %c0_0 = arith.constant 0 : index
    %0 = vector.load %arg3[%c0, %c0_0] : memref<16x32xf32, #tpu.memory_space<vmem>>, vector<16x32xf32>
    %cst = arith.constant 0.000000e+00 : f32
    %1 = vector.broadcast %cst : f32 to vector<16x128xf32>
    %cst_1 = arith.constant 0.000000e+00 : f32
    %2 = vector.broadcast %cst_1 : f32 to vector<16x128xf32>
    %cst_2 = arith.constant 0.000000e+00 : f32
    %3 = vector.broadcast %cst_2 : f32 to vector<16x128xf32>
    %c0_3 = arith.constant 0 : index
    %c0_4 = arith.constant 0 : index
    %4 = vector.load %arg5[%c0_3, %c0_4] : memref<32x4096xf32, #tpu.memory_space<vmem>>, vector<32x128xf32>
    %cst_5 = arith.constant dense<0.000000e+00> : vector<16x128xf32>
    %5 = tpu.matmul %0, %4, %cst_5 {dimension_numbers = #tpu.dot_dimension_numbers<[1], [0], [0], [1], [0, 0, 1, 1], [], []>} : vector<16x32xf32>, vector<32x128xf32>, vector<16x128xf32> -> vector<16x128xf32>
    %c0_6 = arith.constant 0 : index
    %c0_7 = arith.constant 0 : index
    %6 = vector.load %arg6[%c0_6, %c0_7] : memref<1x4096xf32, #tpu.memory_space<vmem>>, vector<1x128xf32>
    %7 = vector.broadcast %6 : vector<1x128xf32> to vector<16x128xf32>
    %8 = arith.addf %5, %7 : vector<16x128xf32>
    %c0_8 = arith.constant 0 : index
    %c0_9 = arith.constant 0 : index
    %c0_10 = arith.constant 0 : index
    %9 = vector.load %arg4[%c0_8, %c0_9, %c0_10] : memref<1x16x32xf32, #tpu.memory_space<vmem>>, vector<1x16x1xf32>
    %10 = vector.shape_cast %9 : vector<1x16x1xf32> to vector<16x1xf32>
    %11 = arith.addf %1, %8 : vector<16x128xf32>
    %12 = arith.mulf %8, %8 : vector<16x128xf32>
    %13 = arith.addf %2, %12 : vector<16x128xf32>
    %14 = vector.broadcast %10 : vector<16x1xf32> to vector<16x128xf32>
    %15 = arith.mulf %8, %14 : vector<16x128xf32>
    %16 = arith.addf %3, %15 : vector<16x128xf32>
    %c0_11 = arith.constant 0 : index
    %c128 = arith.constant 128 : index
    %17 = vector.load %arg5[%c0_11, %c128] : memref<32x4096xf32, #tpu.memory_space<vmem>>, vector<32x128xf32>
    %cst_12 = arith.constant dense<0.000000e+00> : vector<16x128xf32>
    %18 = tpu.matmul %0, %17, %cst_12 {dimension_numbers = #tpu.dot_dimension_numbers<[1], [0], [0], [1], [0, 0, 1, 1], [], []>} : vector<16x32xf32>, vector<32x128xf32>, vector<16x128xf32> -> vector<16x128xf32>
    %c0_13 = arith.constant 0 : index
    %c128_14 = arith.constant 128 : index
    %19 = vector.load %arg6[%c0_13, %c128_14] : memref<1x4096xf32, #tpu.memory_space<vmem>>, vector<1x128xf32>
    %20 = vector.broadcast %19 : vector<1x128xf32> to vector<16x128xf32>
    %21 = arith.addf %18, %20 : vector<16x128xf32>
    %c0_15 = arith.constant 0 : index
    %c0_16 = arith.constant 0 : index
    %c1 = arith.constant 1 : index
    %22 = vector.load %arg4[%c0_15, %c0_16, %c1] : memref<1x16x32xf32, #tpu.memory_space<vmem>>, vector<1x16x1xf32>
    %23 = vector.shape_cast %22 : vector<1x16x1xf32> to vector<16x1xf32>
    %24 = arith.addf %11, %21 : vector<16x128xf32>
    %25 = arith.mulf %21, %21 : vector<16x128xf32>
    %26 = arith.addf %13, %25 : vector<16x128xf32>
    %27 = vector.broadcast %23 : vector<16x1xf32> to vector<16x128xf32>
    %28 = arith.mulf %21, %27 : vector<16x128xf32>
    %29 = arith.addf %16, %28 : vector<16x128xf32>
    %c0_17 = arith.constant 0 : index
    %c256 = arith.constant 256 : index
    %30 = vector.load %arg5[%c0_17, %c256] : memref<32x4096xf32, #tpu.memory_space<vmem>>, vector<32x128xf32>
    %cst_18 = arith.constant dense<0.000000e+00> : vector<16x128xf32>
    %31 = tpu.matmul %0, %30, %cst_18 {dimension_numbers = #tpu.dot_dimension_numbers<[1], [0], [0], [1], [0, 0, 1, 1], [], []>} : vector<16x32xf32>, vector<32x128xf32>, vector<16x128xf32> -> vector<16x128xf32>
    %c0_19 = arith.constant 0 : index
    %c256_20 = arith.constant 256 : index
    %32 = vector.load %arg6[%c0_19, %c256_20] : memref<1x4096xf32, #tpu.memory_space<vmem>>, vector<1x128xf32>
    %33 = vector.broadcast %32 : vector<1x128xf32> to vector<16x128xf32>
    %34 = arith.addf %31, %33 : vector<16x128xf32>
    %c0_21 = arith.constant 0 : index
    %c0_22 = arith.constant 0 : index
    %c2 = arith.constant 2 : index
    %35 = vector.load %arg4[%c0_21, %c0_22, %c2] : memref<1x16x32xf32, #tpu.memory_space<vmem>>, vector<1x16x1xf32>
    %36 = vector.shape_cast %35 : vector<1x16x1xf32> to vector<16x1xf32>
    %37 = arith.addf %24, %34 : vector<16x128xf32>
    %38 = arith.mulf %34, %34 : vector<16x128xf32>
    %39 = arith.addf %26, %38 : vector<16x128xf32>
    %40 = vector.broadcast %36 : vector<16x1xf32> to vector<16x128xf32>
    %41 = arith.mulf %34, %40 : vector<16x128xf32>
    %42 = arith.addf %29, %41 : vector<16x128xf32>
    %c0_23 = arith.constant 0 : index
    %c384 = arith.constant 384 : index
    %43 = vector.load %arg5[%c0_23, %c384] : memref<32x4096xf32, #tpu.memory_space<vmem>>, vector<32x128xf32>
    %cst_24 = arith.constant dense<0.000000e+00> : vector<16x128xf32>
    %44 = tpu.matmul %0, %43, %cst_24 {dimension_numbers = #tpu.dot_dimension_numbers<[1], [0], [0], [1], [0, 0, 1, 1], [], []>} : vector<16x32xf32>, vector<32x128xf32>, vector<16x128xf32> -> vector<16x128xf32>
    %c0_25 = arith.constant 0 : index
    %c384_26 = arith.constant 384 : index
    %45 = vector.load %arg6[%c0_25, %c384_26] : memref<1x4096xf32, #tpu.memory_space<vmem>>, vector<1x128xf32>
    %46 = vector.broadcast %45 : vector<1x128xf32> to vector<16x128xf32>
    %47 = arith.addf %44, %46 : vector<16x128xf32>
    %c0_27 = arith.constant 0 : index
    %c0_28 = arith.constant 0 : index
    %c3 = arith.constant 3 : index
    %48 = vector.load %arg4[%c0_27, %c0_28, %c3] : memref<1x16x32xf32, #tpu.memory_space<vmem>>, vector<1x16x1xf32>
    %49 = vector.shape_cast %48 : vector<1x16x1xf32> to vector<16x1xf32>
    %50 = arith.addf %37, %47 : vector<16x128xf32>
    %51 = arith.mulf %47, %47 : vector<16x128xf32>
    %52 = arith.addf %39, %51 : vector<16x128xf32>
    %53 = vector.broadcast %49 : vector<16x1xf32> to vector<16x128xf32>
    %54 = arith.mulf %47, %53 : vector<16x128xf32>
    %55 = arith.addf %42, %54 : vector<16x128xf32>
    %c0_29 = arith.constant 0 : index
    %c512 = arith.constant 512 : index
    %56 = vector.load %arg5[%c0_29, %c512] : memref<32x4096xf32, #tpu.memory_space<vmem>>, vector<32x128xf32>
    %cst_30 = arith.constant dense<0.000000e+00> : vector<16x128xf32>
    %57 = tpu.matmul %0, %56, %cst_30 {dimension_numbers = #tpu.dot_dimension_numbers<[1], [0], [0], [1], [0, 0, 1, 1], [], []>} : vector<16x32xf32>, vector<32x128xf32>, vector<16x128xf32> -> vector<16x128xf32>
    %c0_31 = arith.constant 0 : index
    %c512_32 = arith.constant 512 : index
    %58 = vector.load %arg6[%c0_31, %c512_32] : memref<1x4096xf32, #tpu.memory_space<vmem>>, vector<1x128xf32>
    %59 = vector.broadcast %58 : vector<1x128xf32> to vector<16x128xf32>
    %60 = arith.addf %57, %59 : vector<16x128xf32>
    %c0_33 = arith.constant 0 : index
    %c0_34 = arith.constant 0 : index
    %c4 = arith.constant 4 : index
    %61 = vector.load %arg4[%c0_33, %c0_34, %c4] : memref<1x16x32xf32, #tpu.memory_space<vmem>>, vector<1x16x1xf32>
    %62 = vector.shape_cast %61 : vector<1x16x1xf32> to vector<16x1xf32>
    %63 = arith.addf %50, %60 : vector<16x128xf32>
    %64 = arith.mulf %60, %60 : vector<16x128xf32>
    %65 = arith.addf %52, %64 : vector<16x128xf32>
    %66 = vector.broadcast %62 : vector<16x1xf32> to vector<16x128xf32>
    %67 = arith.mulf %60, %66 : vector<16x128xf32>
    %68 = arith.addf %55, %67 : vector<16x128xf32>
    %c0_35 = arith.constant 0 : index
    %c640 = arith.constant 640 : index
    %69 = vector.load %arg5[%c0_35, %c640] : memref<32x4096xf32, #tpu.memory_space<vmem>>, vector<32x128xf32>
    %cst_36 = arith.constant dense<0.000000e+00> : vector<16x128xf32>
    %70 = tpu.matmul %0, %69, %cst_36 {dimension_numbers = #tpu.dot_dimension_numbers<[1], [0], [0], [1], [0, 0, 1, 1], [], []>} : vector<16x32xf32>, vector<32x128xf32>, vector<16x128xf32> -> vector<16x128xf32>
    %c0_37 = arith.constant 0 : index
    %c640_38 = arith.constant 640 : index
    %71 = vector.load %arg6[%c0_37, %c640_38] : memref<1x4096xf32, #tpu.memory_space<vmem>>, vector<1x128xf32>
    %72 = vector.broadcast %71 : vector<1x128xf32> to vector<16x128xf32>
    %73 = arith.addf %70, %72 : vector<16x128xf32>
    %c0_39 = arith.constant 0 : index
    %c0_40 = arith.constant 0 : index
    %c5 = arith.constant 5 : index
    %74 = vector.load %arg4[%c0_39, %c0_40, %c5] : memref<1x16x32xf32, #tpu.memory_space<vmem>>, vector<1x16x1xf32>
    %75 = vector.shape_cast %74 : vector<1x16x1xf32> to vector<16x1xf32>
    %76 = arith.addf %63, %73 : vector<16x128xf32>
    %77 = arith.mulf %73, %73 : vector<16x128xf32>
    %78 = arith.addf %65, %77 : vector<16x128xf32>
    %79 = vector.broadcast %75 : vector<16x1xf32> to vector<16x128xf32>
    %80 = arith.mulf %73, %79 : vector<16x128xf32>
    %81 = arith.addf %68, %80 : vector<16x128xf32>
    %c0_41 = arith.constant 0 : index
    %c768 = arith.constant 768 : index
    %82 = vector.load %arg5[%c0_41, %c768] : memref<32x4096xf32, #tpu.memory_space<vmem>>, vector<32x128xf32>
    %cst_42 = arith.constant dense<0.000000e+00> : vector<16x128xf32>
    %83 = tpu.matmul %0, %82, %cst_42 {dimension_numbers = #tpu.dot_dimension_numbers<[1], [0], [0], [1], [0, 0, 1, 1], [], []>} : vector<16x32xf32>, vector<32x128xf32>, vector<16x128xf32> -> vector<16x128xf32>
    %c0_43 = arith.constant 0 : index
    %c768_44 = arith.constant 768 : index
    %84 = vector.load %arg6[%c0_43, %c768_44] : memref<1x4096xf32, #tpu.memory_space<vmem>>, vector<1x128xf32>
    %85 = vector.broadcast %84 : vector<1x128xf32> to vector<16x128xf32>
    %86 = arith.addf %83, %85 : vector<16x128xf32>
    %c0_45 = arith.constant 0 : index
    %c0_46 = arith.constant 0 : index
    %c6 = arith.constant 6 : index
    %87 = vector.load %arg4[%c0_45, %c0_46, %c6] : memref<1x16x32xf32, #tpu.memory_space<vmem>>, vector<1x16x1xf32>
    %88 = vector.shape_cast %87 : vector<1x16x1xf32> to vector<16x1xf32>
    %89 = arith.addf %76, %86 : vector<16x128xf32>
    %90 = arith.mulf %86, %86 : vector<16x128xf32>
    %91 = arith.addf %78, %90 : vector<16x128xf32>
    %92 = vector.broadcast %88 : vector<16x1xf32> to vector<16x128xf32>
    %93 = arith.mulf %86, %92 : vector<16x128xf32>
    %94 = arith.addf %81, %93 : vector<16x128xf32>
    %c0_47 = arith.constant 0 : index
    %c896 = arith.constant 896 : index
    %95 = vector.load %arg5[%c0_47, %c896] : memref<32x4096xf32, #tpu.memory_space<vmem>>, vector<32x128xf32>
    %cst_48 = arith.constant dense<0.000000e+00> : vector<16x128xf32>
    %96 = tpu.matmul %0, %95, %cst_48 {dimension_numbers = #tpu.dot_dimension_numbers<[1], [0], [0], [1], [0, 0, 1, 1], [], []>} : vector<16x32xf32>, vector<32x128xf32>, vector<16x128xf32> -> vector<16x128xf32>
    %c0_49 = arith.constant 0 : index
    %c896_50 = arith.constant 896 : index
    %97 = vector.load %arg6[%c0_49, %c896_50] : memref<1x4096xf32, #tpu.memory_space<vmem>>, vector<1x128xf32>
    %98 = vector.broadcast %97 : vector<1x128xf32> to vector<16x128xf32>
    %99 = arith.addf %96, %98 : vector<16x128xf32>
    %c0_51 = arith.constant 0 : index
    %c0_52 = arith.constant 0 : index
    %c7 = arith.constant 7 : index
    %100 = vector.load %arg4[%c0_51, %c0_52, %c7] : memref<1x16x32xf32, #tpu.memory_space<vmem>>, vector<1x16x1xf32>
    %101 = vector.shape_cast %100 : vector<1x16x1xf32> to vector<16x1xf32>
    %102 = arith.addf %89, %99 : vector<16x128xf32>
    %103 = arith.mulf %99, %99 : vector<16x128xf32>
    %104 = arith.addf %91, %103 : vector<16x128xf32>
    %105 = vector.broadcast %101 : vector<16x1xf32> to vector<16x128xf32>
    %106 = arith.mulf %99, %105 : vector<16x128xf32>
    %107 = arith.addf %94, %106 : vector<16x128xf32>
    %c0_53 = arith.constant 0 : index
    %c1024 = arith.constant 1024 : index
    %108 = vector.load %arg5[%c0_53, %c1024] : memref<32x4096xf32, #tpu.memory_space<vmem>>, vector<32x128xf32>
    %cst_54 = arith.constant dense<0.000000e+00> : vector<16x128xf32>
    %109 = tpu.matmul %0, %108, %cst_54 {dimension_numbers = #tpu.dot_dimension_numbers<[1], [0], [0], [1], [0, 0, 1, 1], [], []>} : vector<16x32xf32>, vector<32x128xf32>, vector<16x128xf32> -> vector<16x128xf32>
    %c0_55 = arith.constant 0 : index
    %c1024_56 = arith.constant 1024 : index
    %110 = vector.load %arg6[%c0_55, %c1024_56] : memref<1x4096xf32, #tpu.memory_space<vmem>>, vector<1x128xf32>
    %111 = vector.broadcast %110 : vector<1x128xf32> to vector<16x128xf32>
    %112 = arith.addf %109, %111 : vector<16x128xf32>
    %c0_57 = arith.constant 0 : index
    %c0_58 = arith.constant 0 : index
    %c8 = arith.constant 8 : index
    %113 = vector.load %arg4[%c0_57, %c0_58, %c8] : memref<1x16x32xf32, #tpu.memory_space<vmem>>, vector<1x16x1xf32>
    %114 = vector.shape_cast %113 : vector<1x16x1xf32> to vector<16x1xf32>
    %115 = arith.addf %102, %112 : vector<16x128xf32>
    %116 = arith.mulf %112, %112 : vector<16x128xf32>
    %117 = arith.addf %104, %116 : vector<16x128xf32>
    %118 = vector.broadcast %114 : vector<16x1xf32> to vector<16x128xf32>
    %119 = arith.mulf %112, %118 : vector<16x128xf32>
    %120 = arith.addf %107, %119 : vector<16x128xf32>
    %c0_59 = arith.constant 0 : index
    %c1152 = arith.constant 1152 : index
    %121 = vector.load %arg5[%c0_59, %c1152] : memref<32x4096xf32, #tpu.memory_space<vmem>>, vector<32x128xf32>
    %cst_60 = arith.constant dense<0.000000e+00> : vector<16x128xf32>
    %122 = tpu.matmul %0, %121, %cst_60 {dimension_numbers = #tpu.dot_dimension_numbers<[1], [0], [0], [1], [0, 0, 1, 1], [], []>} : vector<16x32xf32>, vector<32x128xf32>, vector<16x128xf32> -> vector<16x128xf32>
    %c0_61 = arith.constant 0 : index
    %c1152_62 = arith.constant 1152 : index
    %123 = vector.load %arg6[%c0_61, %c1152_62] : memref<1x4096xf32, #tpu.memory_space<vmem>>, vector<1x128xf32>
    %124 = vector.broadcast %123 : vector<1x128xf32> to vector<16x128xf32>
    %125 = arith.addf %122, %124 : vector<16x128xf32>
    %c0_63 = arith.constant 0 : index
    %c0_64 = arith.constant 0 : index
    %c9 = arith.constant 9 : index
    %126 = vector.load %arg4[%c0_63, %c0_64, %c9] : memref<1x16x32xf32, #tpu.memory_space<vmem>>, vector<1x16x1xf32>
    %127 = vector.shape_cast %126 : vector<1x16x1xf32> to vector<16x1xf32>
    %128 = arith.addf %115, %125 : vector<16x128xf32>
    %129 = arith.mulf %125, %125 : vector<16x128xf32>
    %130 = arith.addf %117, %129 : vector<16x128xf32>
    %131 = vector.broadcast %127 : vector<16x1xf32> to vector<16x128xf32>
    %132 = arith.mulf %125, %131 : vector<16x128xf32>
    %133 = arith.addf %120, %132 : vector<16x128xf32>
    %c0_65 = arith.constant 0 : index
    %c1280 = arith.constant 1280 : index
    %134 = vector.load %arg5[%c0_65, %c1280] : memref<32x4096xf32, #tpu.memory_space<vmem>>, vector<32x128xf32>
    %cst_66 = arith.constant dense<0.000000e+00> : vector<16x128xf32>
    %135 = tpu.matmul %0, %134, %cst_66 {dimension_numbers = #tpu.dot_dimension_numbers<[1], [0], [0], [1], [0, 0, 1, 1], [], []>} : vector<16x32xf32>, vector<32x128xf32>, vector<16x128xf32> -> vector<16x128xf32>
    %c0_67 = arith.constant 0 : index
    %c1280_68 = arith.constant 1280 : index
    %136 = vector.load %arg6[%c0_67, %c1280_68] : memref<1x4096xf32, #tpu.memory_space<vmem>>, vector<1x128xf32>
    %137 = vector.broadcast %136 : vector<1x128xf32> to vector<16x128xf32>
    %138 = arith.addf %135, %137 : vector<16x128xf32>
    %c0_69 = arith.constant 0 : index
    %c0_70 = arith.constant 0 : index
    %c10 = arith.constant 10 : index
    %139 = vector.load %arg4[%c0_69, %c0_70, %c10] : memref<1x16x32xf32, #tpu.memory_space<vmem>>, vector<1x16x1xf32>
    %140 = vector.shape_cast %139 : vector<1x16x1xf32> to vector<16x1xf32>
    %141 = arith.addf %128, %138 : vector<16x128xf32>
    %142 = arith.mulf %138, %138 : vector<16x128xf32>
    %143 = arith.addf %130, %142 : vector<16x128xf32>
    %144 = vector.broadcast %140 : vector<16x1xf32> to vector<16x128xf32>
    %145 = arith.mulf %138, %144 : vector<16x128xf32>
    %146 = arith.addf %133, %145 : vector<16x128xf32>
    %c0_71 = arith.constant 0 : index
    %c1408 = arith.constant 1408 : index
    %147 = vector.load %arg5[%c0_71, %c1408] : memref<32x4096xf32, #tpu.memory_space<vmem>>, vector<32x128xf32>
    %cst_72 = arith.constant dense<0.000000e+00> : vector<16x128xf32>
    %148 = tpu.matmul %0, %147, %cst_72 {dimension_numbers = #tpu.dot_dimension_numbers<[1], [0], [0], [1], [0, 0, 1, 1], [], []>} : vector<16x32xf32>, vector<32x128xf32>, vector<16x128xf32> -> vector<16x128xf32>
    %c0_73 = arith.constant 0 : index
    %c1408_74 = arith.constant 1408 : index
    %149 = vector.load %arg6[%c0_73, %c1408_74] : memref<1x4096xf32, #tpu.memory_space<vmem>>, vector<1x128xf32>
    %150 = vector.broadcast %149 : vector<1x128xf32> to vector<16x128xf32>
    %151 = arith.addf %148, %150 : vector<16x128xf32>
    %c0_75 = arith.constant 0 : index
    %c0_76 = arith.constant 0 : index
    %c11 = arith.constant 11 : index
    %152 = vector.load %arg4[%c0_75, %c0_76, %c11] : memref<1x16x32xf32, #tpu.memory_space<vmem>>, vector<1x16x1xf32>
    %153 = vector.shape_cast %152 : vector<1x16x1xf32> to vector<16x1xf32>
    %154 = arith.addf %141, %151 : vector<16x128xf32>
    %155 = arith.mulf %151, %151 : vector<16x128xf32>
    %156 = arith.addf %143, %155 : vector<16x128xf32>
    %157 = vector.broadcast %153 : vector<16x1xf32> to vector<16x128xf32>
    %158 = arith.mulf %151, %157 : vector<16x128xf32>
    %159 = arith.addf %146, %158 : vector<16x128xf32>
    %c0_77 = arith.constant 0 : index
    %c1536 = arith.constant 1536 : index
    %160 = vector.load %arg5[%c0_77, %c1536] : memref<32x4096xf32, #tpu.memory_space<vmem>>, vector<32x128xf32>
    %cst_78 = arith.constant dense<0.000000e+00> : vector<16x128xf32>
    %161 = tpu.matmul %0, %160, %cst_78 {dimension_numbers = #tpu.dot_dimension_numbers<[1], [0], [0], [1], [0, 0, 1, 1], [], []>} : vector<16x32xf32>, vector<32x128xf32>, vector<16x128xf32> -> vector<16x128xf32>
    %c0_79 = arith.constant 0 : index
    %c1536_80 = arith.constant 1536 : index
    %162 = vector.load %arg6[%c0_79, %c1536_80] : memref<1x4096xf32, #tpu.memory_space<vmem>>, vector<1x128xf32>
    %163 = vector.broadcast %162 : vector<1x128xf32> to vector<16x128xf32>
    %164 = arith.addf %161, %163 : vector<16x128xf32>
    %c0_81 = arith.constant 0 : index
    %c0_82 = arith.constant 0 : index
    %c12 = arith.constant 12 : index
    %165 = vector.load %arg4[%c0_81, %c0_82, %c12] : memref<1x16x32xf32, #tpu.memory_space<vmem>>, vector<1x16x1xf32>
    %166 = vector.shape_cast %165 : vector<1x16x1xf32> to vector<16x1xf32>
    %167 = arith.addf %154, %164 : vector<16x128xf32>
    %168 = arith.mulf %164, %164 : vector<16x128xf32>
    %169 = arith.addf %156, %168 : vector<16x128xf32>
    %170 = vector.broadcast %166 : vector<16x1xf32> to vector<16x128xf32>
    %171 = arith.mulf %164, %170 : vector<16x128xf32>
    %172 = arith.addf %159, %171 : vector<16x128xf32>
    %c0_83 = arith.constant 0 : index
    %c1664 = arith.constant 1664 : index
    %173 = vector.load %arg5[%c0_83, %c1664] : memref<32x4096xf32, #tpu.memory_space<vmem>>, vector<32x128xf32>
    %cst_84 = arith.constant dense<0.000000e+00> : vector<16x128xf32>
    %174 = tpu.matmul %0, %173, %cst_84 {dimension_numbers = #tpu.dot_dimension_numbers<[1], [0], [0], [1], [0, 0, 1, 1], [], []>} : vector<16x32xf32>, vector<32x128xf32>, vector<16x128xf32> -> vector<16x128xf32>
    %c0_85 = arith.constant 0 : index
    %c1664_86 = arith.constant 1664 : index
    %175 = vector.load %arg6[%c0_85, %c1664_86] : memref<1x4096xf32, #tpu.memory_space<vmem>>, vector<1x128xf32>
    %176 = vector.broadcast %175 : vector<1x128xf32> to vector<16x128xf32>
    %177 = arith.addf %174, %176 : vector<16x128xf32>
    %c0_87 = arith.constant 0 : index
    %c0_88 = arith.constant 0 : index
    %c13 = arith.constant 13 : index
    %178 = vector.load %arg4[%c0_87, %c0_88, %c13] : memref<1x16x32xf32, #tpu.memory_space<vmem>>, vector<1x16x1xf32>
    %179 = vector.shape_cast %178 : vector<1x16x1xf32> to vector<16x1xf32>
    %180 = arith.addf %167, %177 : vector<16x128xf32>
    %181 = arith.mulf %177, %177 : vector<16x128xf32>
    %182 = arith.addf %169, %181 : vector<16x128xf32>
    %183 = vector.broadcast %179 : vector<16x1xf32> to vector<16x128xf32>
    %184 = arith.mulf %177, %183 : vector<16x128xf32>
    %185 = arith.addf %172, %184 : vector<16x128xf32>
    %c0_89 = arith.constant 0 : index
    %c1792 = arith.constant 1792 : index
    %186 = vector.load %arg5[%c0_89, %c1792] : memref<32x4096xf32, #tpu.memory_space<vmem>>, vector<32x128xf32>
    %cst_90 = arith.constant dense<0.000000e+00> : vector<16x128xf32>
    %187 = tpu.matmul %0, %186, %cst_90 {dimension_numbers = #tpu.dot_dimension_numbers<[1], [0], [0], [1], [0, 0, 1, 1], [], []>} : vector<16x32xf32>, vector<32x128xf32>, vector<16x128xf32> -> vector<16x128xf32>
    %c0_91 = arith.constant 0 : index
    %c1792_92 = arith.constant 1792 : index
    %188 = vector.load %arg6[%c0_91, %c1792_92] : memref<1x4096xf32, #tpu.memory_space<vmem>>, vector<1x128xf32>
    %189 = vector.broadcast %188 : vector<1x128xf32> to vector<16x128xf32>
    %190 = arith.addf %187, %189 : vector<16x128xf32>
    %c0_93 = arith.constant 0 : index
    %c0_94 = arith.constant 0 : index
    %c14 = arith.constant 14 : index
    %191 = vector.load %arg4[%c0_93, %c0_94, %c14] : memref<1x16x32xf32, #tpu.memory_space<vmem>>, vector<1x16x1xf32>
    %192 = vector.shape_cast %191 : vector<1x16x1xf32> to vector<16x1xf32>
    %193 = arith.addf %180, %190 : vector<16x128xf32>
    %194 = arith.mulf %190, %190 : vector<16x128xf32>
    %195 = arith.addf %182, %194 : vector<16x128xf32>
    %196 = vector.broadcast %192 : vector<16x1xf32> to vector<16x128xf32>
    %197 = arith.mulf %190, %196 : vector<16x128xf32>
    %198 = arith.addf %185, %197 : vector<16x128xf32>
    %c0_95 = arith.constant 0 : index
    %c1920 = arith.constant 1920 : index
    %199 = vector.load %arg5[%c0_95, %c1920] : memref<32x4096xf32, #tpu.memory_space<vmem>>, vector<32x128xf32>
    %cst_96 = arith.constant dense<0.000000e+00> : vector<16x128xf32>
    %200 = tpu.matmul %0, %199, %cst_96 {dimension_numbers = #tpu.dot_dimension_numbers<[1], [0], [0], [1], [0, 0, 1, 1], [], []>} : vector<16x32xf32>, vector<32x128xf32>, vector<16x128xf32> -> vector<16x128xf32>
    %c0_97 = arith.constant 0 : index
    %c1920_98 = arith.constant 1920 : index
    %201 = vector.load %arg6[%c0_97, %c1920_98] : memref<1x4096xf32, #tpu.memory_space<vmem>>, vector<1x128xf32>
    %202 = vector.broadcast %201 : vector<1x128xf32> to vector<16x128xf32>
    %203 = arith.addf %200, %202 : vector<16x128xf32>
    %c0_99 = arith.constant 0 : index
    %c0_100 = arith.constant 0 : index
    %c15 = arith.constant 15 : index
    %204 = vector.load %arg4[%c0_99, %c0_100, %c15] : memref<1x16x32xf32, #tpu.memory_space<vmem>>, vector<1x16x1xf32>
    %205 = vector.shape_cast %204 : vector<1x16x1xf32> to vector<16x1xf32>
    %206 = arith.addf %193, %203 : vector<16x128xf32>
    %207 = arith.mulf %203, %203 : vector<16x128xf32>
    %208 = arith.addf %195, %207 : vector<16x128xf32>
    %209 = vector.broadcast %205 : vector<16x1xf32> to vector<16x128xf32>
    %210 = arith.mulf %203, %209 : vector<16x128xf32>
    %211 = arith.addf %198, %210 : vector<16x128xf32>
    %c0_101 = arith.constant 0 : index
    %c2048 = arith.constant 2048 : index
    %212 = vector.load %arg5[%c0_101, %c2048] : memref<32x4096xf32, #tpu.memory_space<vmem>>, vector<32x128xf32>
    %cst_102 = arith.constant dense<0.000000e+00> : vector<16x128xf32>
    %213 = tpu.matmul %0, %212, %cst_102 {dimension_numbers = #tpu.dot_dimension_numbers<[1], [0], [0], [1], [0, 0, 1, 1], [], []>} : vector<16x32xf32>, vector<32x128xf32>, vector<16x128xf32> -> vector<16x128xf32>
    %c0_103 = arith.constant 0 : index
    %c2048_104 = arith.constant 2048 : index
    %214 = vector.load %arg6[%c0_103, %c2048_104] : memref<1x4096xf32, #tpu.memory_space<vmem>>, vector<1x128xf32>
    %215 = vector.broadcast %214 : vector<1x128xf32> to vector<16x128xf32>
    %216 = arith.addf %213, %215 : vector<16x128xf32>
    %c0_105 = arith.constant 0 : index
    %c0_106 = arith.constant 0 : index
    %c16 = arith.constant 16 : index
    %217 = vector.load %arg4[%c0_105, %c0_106, %c16] : memref<1x16x32xf32, #tpu.memory_space<vmem>>, vector<1x16x1xf32>
    %218 = vector.shape_cast %217 : vector<1x16x1xf32> to vector<16x1xf32>
    %219 = arith.addf %206, %216 : vector<16x128xf32>
    %220 = arith.mulf %216, %216 : vector<16x128xf32>
    %221 = arith.addf %208, %220 : vector<16x128xf32>
    %222 = vector.broadcast %218 : vector<16x1xf32> to vector<16x128xf32>
    %223 = arith.mulf %216, %222 : vector<16x128xf32>
    %224 = arith.addf %211, %223 : vector<16x128xf32>
    %c0_107 = arith.constant 0 : index
    %c2176 = arith.constant 2176 : index
    %225 = vector.load %arg5[%c0_107, %c2176] : memref<32x4096xf32, #tpu.memory_space<vmem>>, vector<32x128xf32>
    %cst_108 = arith.constant dense<0.000000e+00> : vector<16x128xf32>
    %226 = tpu.matmul %0, %225, %cst_108 {dimension_numbers = #tpu.dot_dimension_numbers<[1], [0], [0], [1], [0, 0, 1, 1], [], []>} : vector<16x32xf32>, vector<32x128xf32>, vector<16x128xf32> -> vector<16x128xf32>
    %c0_109 = arith.constant 0 : index
    %c2176_110 = arith.constant 2176 : index
    %227 = vector.load %arg6[%c0_109, %c2176_110] : memref<1x4096xf32, #tpu.memory_space<vmem>>, vector<1x128xf32>
    %228 = vector.broadcast %227 : vector<1x128xf32> to vector<16x128xf32>
    %229 = arith.addf %226, %228 : vector<16x128xf32>
    %c0_111 = arith.constant 0 : index
    %c0_112 = arith.constant 0 : index
    %c17 = arith.constant 17 : index
    %230 = vector.load %arg4[%c0_111, %c0_112, %c17] : memref<1x16x32xf32, #tpu.memory_space<vmem>>, vector<1x16x1xf32>
    %231 = vector.shape_cast %230 : vector<1x16x1xf32> to vector<16x1xf32>
    %232 = arith.addf %219, %229 : vector<16x128xf32>
    %233 = arith.mulf %229, %229 : vector<16x128xf32>
    %234 = arith.addf %221, %233 : vector<16x128xf32>
    %235 = vector.broadcast %231 : vector<16x1xf32> to vector<16x128xf32>
    %236 = arith.mulf %229, %235 : vector<16x128xf32>
    %237 = arith.addf %224, %236 : vector<16x128xf32>
    %c0_113 = arith.constant 0 : index
    %c2304 = arith.constant 2304 : index
    %238 = vector.load %arg5[%c0_113, %c2304] : memref<32x4096xf32, #tpu.memory_space<vmem>>, vector<32x128xf32>
    %cst_114 = arith.constant dense<0.000000e+00> : vector<16x128xf32>
    %239 = tpu.matmul %0, %238, %cst_114 {dimension_numbers = #tpu.dot_dimension_numbers<[1], [0], [0], [1], [0, 0, 1, 1], [], []>} : vector<16x32xf32>, vector<32x128xf32>, vector<16x128xf32> -> vector<16x128xf32>
    %c0_115 = arith.constant 0 : index
    %c2304_116 = arith.constant 2304 : index
    %240 = vector.load %arg6[%c0_115, %c2304_116] : memref<1x4096xf32, #tpu.memory_space<vmem>>, vector<1x128xf32>
    %241 = vector.broadcast %240 : vector<1x128xf32> to vector<16x128xf32>
    %242 = arith.addf %239, %241 : vector<16x128xf32>
    %c0_117 = arith.constant 0 : index
    %c0_118 = arith.constant 0 : index
    %c18 = arith.constant 18 : index
    %243 = vector.load %arg4[%c0_117, %c0_118, %c18] : memref<1x16x32xf32, #tpu.memory_space<vmem>>, vector<1x16x1xf32>
    %244 = vector.shape_cast %243 : vector<1x16x1xf32> to vector<16x1xf32>
    %245 = arith.addf %232, %242 : vector<16x128xf32>
    %246 = arith.mulf %242, %242 : vector<16x128xf32>
    %247 = arith.addf %234, %246 : vector<16x128xf32>
    %248 = vector.broadcast %244 : vector<16x1xf32> to vector<16x128xf32>
    %249 = arith.mulf %242, %248 : vector<16x128xf32>
    %250 = arith.addf %237, %249 : vector<16x128xf32>
    %c0_119 = arith.constant 0 : index
    %c2432 = arith.constant 2432 : index
    %251 = vector.load %arg5[%c0_119, %c2432] : memref<32x4096xf32, #tpu.memory_space<vmem>>, vector<32x128xf32>
    %cst_120 = arith.constant dense<0.000000e+00> : vector<16x128xf32>
    %252 = tpu.matmul %0, %251, %cst_120 {dimension_numbers = #tpu.dot_dimension_numbers<[1], [0], [0], [1], [0, 0, 1, 1], [], []>} : vector<16x32xf32>, vector<32x128xf32>, vector<16x128xf32> -> vector<16x128xf32>
    %c0_121 = arith.constant 0 : index
    %c2432_122 = arith.constant 2432 : index
    %253 = vector.load %arg6[%c0_121, %c2432_122] : memref<1x4096xf32, #tpu.memory_space<vmem>>, vector<1x128xf32>
    %254 = vector.broadcast %253 : vector<1x128xf32> to vector<16x128xf32>
    %255 = arith.addf %252, %254 : vector<16x128xf32>
    %c0_123 = arith.constant 0 : index
    %c0_124 = arith.constant 0 : index
    %c19 = arith.constant 19 : index
    %256 = vector.load %arg4[%c0_123, %c0_124, %c19] : memref<1x16x32xf32, #tpu.memory_space<vmem>>, vector<1x16x1xf32>
    %257 = vector.shape_cast %256 : vector<1x16x1xf32> to vector<16x1xf32>
    %258 = arith.addf %245, %255 : vector<16x128xf32>
    %259 = arith.mulf %255, %255 : vector<16x128xf32>
    %260 = arith.addf %247, %259 : vector<16x128xf32>
    %261 = vector.broadcast %257 : vector<16x1xf32> to vector<16x128xf32>
    %262 = arith.mulf %255, %261 : vector<16x128xf32>
    %263 = arith.addf %250, %262 : vector<16x128xf32>
    %c0_125 = arith.constant 0 : index
    %c2560 = arith.constant 2560 : index
    %264 = vector.load %arg5[%c0_125, %c2560] : memref<32x4096xf32, #tpu.memory_space<vmem>>, vector<32x128xf32>
    %cst_126 = arith.constant dense<0.000000e+00> : vector<16x128xf32>
    %265 = tpu.matmul %0, %264, %cst_126 {dimension_numbers = #tpu.dot_dimension_numbers<[1], [0], [0], [1], [0, 0, 1, 1], [], []>} : vector<16x32xf32>, vector<32x128xf32>, vector<16x128xf32> -> vector<16x128xf32>
    %c0_127 = arith.constant 0 : index
    %c2560_128 = arith.constant 2560 : index
    %266 = vector.load %arg6[%c0_127, %c2560_128] : memref<1x4096xf32, #tpu.memory_space<vmem>>, vector<1x128xf32>
    %267 = vector.broadcast %266 : vector<1x128xf32> to vector<16x128xf32>
    %268 = arith.addf %265, %267 : vector<16x128xf32>
    %c0_129 = arith.constant 0 : index
    %c0_130 = arith.constant 0 : index
    %c20 = arith.constant 20 : index
    %269 = vector.load %arg4[%c0_129, %c0_130, %c20] : memref<1x16x32xf32, #tpu.memory_space<vmem>>, vector<1x16x1xf32>
    %270 = vector.shape_cast %269 : vector<1x16x1xf32> to vector<16x1xf32>
    %271 = arith.addf %258, %268 : vector<16x128xf32>
    %272 = arith.mulf %268, %268 : vector<16x128xf32>
    %273 = arith.addf %260, %272 : vector<16x128xf32>
    %274 = vector.broadcast %270 : vector<16x1xf32> to vector<16x128xf32>
    %275 = arith.mulf %268, %274 : vector<16x128xf32>
    %276 = arith.addf %263, %275 : vector<16x128xf32>
    %c0_131 = arith.constant 0 : index
    %c2688 = arith.constant 2688 : index
    %277 = vector.load %arg5[%c0_131, %c2688] : memref<32x4096xf32, #tpu.memory_space<vmem>>, vector<32x128xf32>
    %cst_132 = arith.constant dense<0.000000e+00> : vector<16x128xf32>
    %278 = tpu.matmul %0, %277, %cst_132 {dimension_numbers = #tpu.dot_dimension_numbers<[1], [0], [0], [1], [0, 0, 1, 1], [], []>} : vector<16x32xf32>, vector<32x128xf32>, vector<16x128xf32> -> vector<16x128xf32>
    %c0_133 = arith.constant 0 : index
    %c2688_134 = arith.constant 2688 : index
    %279 = vector.load %arg6[%c0_133, %c2688_134] : memref<1x4096xf32, #tpu.memory_space<vmem>>, vector<1x128xf32>
    %280 = vector.broadcast %279 : vector<1x128xf32> to vector<16x128xf32>
    %281 = arith.addf %278, %280 : vector<16x128xf32>
    %c0_135 = arith.constant 0 : index
    %c0_136 = arith.constant 0 : index
    %c21 = arith.constant 21 : index
    %282 = vector.load %arg4[%c0_135, %c0_136, %c21] : memref<1x16x32xf32, #tpu.memory_space<vmem>>, vector<1x16x1xf32>
    %283 = vector.shape_cast %282 : vector<1x16x1xf32> to vector<16x1xf32>
    %284 = arith.addf %271, %281 : vector<16x128xf32>
    %285 = arith.mulf %281, %281 : vector<16x128xf32>
    %286 = arith.addf %273, %285 : vector<16x128xf32>
    %287 = vector.broadcast %283 : vector<16x1xf32> to vector<16x128xf32>
    %288 = arith.mulf %281, %287 : vector<16x128xf32>
    %289 = arith.addf %276, %288 : vector<16x128xf32>
    %c0_137 = arith.constant 0 : index
    %c2816 = arith.constant 2816 : index
    %290 = vector.load %arg5[%c0_137, %c2816] : memref<32x4096xf32, #tpu.memory_space<vmem>>, vector<32x128xf32>
    %cst_138 = arith.constant dense<0.000000e+00> : vector<16x128xf32>
    %291 = tpu.matmul %0, %290, %cst_138 {dimension_numbers = #tpu.dot_dimension_numbers<[1], [0], [0], [1], [0, 0, 1, 1], [], []>} : vector<16x32xf32>, vector<32x128xf32>, vector<16x128xf32> -> vector<16x128xf32>
    %c0_139 = arith.constant 0 : index
    %c2816_140 = arith.constant 2816 : index
    %292 = vector.load %arg6[%c0_139, %c2816_140] : memref<1x4096xf32, #tpu.memory_space<vmem>>, vector<1x128xf32>
    %293 = vector.broadcast %292 : vector<1x128xf32> to vector<16x128xf32>
    %294 = arith.addf %291, %293 : vector<16x128xf32>
    %c0_141 = arith.constant 0 : index
    %c0_142 = arith.constant 0 : index
    %c22 = arith.constant 22 : index
    %295 = vector.load %arg4[%c0_141, %c0_142, %c22] : memref<1x16x32xf32, #tpu.memory_space<vmem>>, vector<1x16x1xf32>
    %296 = vector.shape_cast %295 : vector<1x16x1xf32> to vector<16x1xf32>
    %297 = arith.addf %284, %294 : vector<16x128xf32>
    %298 = arith.mulf %294, %294 : vector<16x128xf32>
    %299 = arith.addf %286, %298 : vector<16x128xf32>
    %300 = vector.broadcast %296 : vector<16x1xf32> to vector<16x128xf32>
    %301 = arith.mulf %294, %300 : vector<16x128xf32>
    %302 = arith.addf %289, %301 : vector<16x128xf32>
    %c0_143 = arith.constant 0 : index
    %c2944 = arith.constant 2944 : index
    %303 = vector.load %arg5[%c0_143, %c2944] : memref<32x4096xf32, #tpu.memory_space<vmem>>, vector<32x128xf32>
    %cst_144 = arith.constant dense<0.000000e+00> : vector<16x128xf32>
    %304 = tpu.matmul %0, %303, %cst_144 {dimension_numbers = #tpu.dot_dimension_numbers<[1], [0], [0], [1], [0, 0, 1, 1], [], []>} : vector<16x32xf32>, vector<32x128xf32>, vector<16x128xf32> -> vector<16x128xf32>
    %c0_145 = arith.constant 0 : index
    %c2944_146 = arith.constant 2944 : index
    %305 = vector.load %arg6[%c0_145, %c2944_146] : memref<1x4096xf32, #tpu.memory_space<vmem>>, vector<1x128xf32>
    %306 = vector.broadcast %305 : vector<1x128xf32> to vector<16x128xf32>
    %307 = arith.addf %304, %306 : vector<16x128xf32>
    %c0_147 = arith.constant 0 : index
    %c0_148 = arith.constant 0 : index
    %c23 = arith.constant 23 : index
    %308 = vector.load %arg4[%c0_147, %c0_148, %c23] : memref<1x16x32xf32, #tpu.memory_space<vmem>>, vector<1x16x1xf32>
    %309 = vector.shape_cast %308 : vector<1x16x1xf32> to vector<16x1xf32>
    %310 = arith.addf %297, %307 : vector<16x128xf32>
    %311 = arith.mulf %307, %307 : vector<16x128xf32>
    %312 = arith.addf %299, %311 : vector<16x128xf32>
    %313 = vector.broadcast %309 : vector<16x1xf32> to vector<16x128xf32>
    %314 = arith.mulf %307, %313 : vector<16x128xf32>
    %315 = arith.addf %302, %314 : vector<16x128xf32>
    %c0_149 = arith.constant 0 : index
    %c3072 = arith.constant 3072 : index
    %316 = vector.load %arg5[%c0_149, %c3072] : memref<32x4096xf32, #tpu.memory_space<vmem>>, vector<32x128xf32>
    %cst_150 = arith.constant dense<0.000000e+00> : vector<16x128xf32>
    %317 = tpu.matmul %0, %316, %cst_150 {dimension_numbers = #tpu.dot_dimension_numbers<[1], [0], [0], [1], [0, 0, 1, 1], [], []>} : vector<16x32xf32>, vector<32x128xf32>, vector<16x128xf32> -> vector<16x128xf32>
    %c0_151 = arith.constant 0 : index
    %c3072_152 = arith.constant 3072 : index
    %318 = vector.load %arg6[%c0_151, %c3072_152] : memref<1x4096xf32, #tpu.memory_space<vmem>>, vector<1x128xf32>
    %319 = vector.broadcast %318 : vector<1x128xf32> to vector<16x128xf32>
    %320 = arith.addf %317, %319 : vector<16x128xf32>
    %c0_153 = arith.constant 0 : index
    %c0_154 = arith.constant 0 : index
    %c24 = arith.constant 24 : index
    %321 = vector.load %arg4[%c0_153, %c0_154, %c24] : memref<1x16x32xf32, #tpu.memory_space<vmem>>, vector<1x16x1xf32>
    %322 = vector.shape_cast %321 : vector<1x16x1xf32> to vector<16x1xf32>
    %323 = arith.addf %310, %320 : vector<16x128xf32>
    %324 = arith.mulf %320, %320 : vector<16x128xf32>
    %325 = arith.addf %312, %324 : vector<16x128xf32>
    %326 = vector.broadcast %322 : vector<16x1xf32> to vector<16x128xf32>
    %327 = arith.mulf %320, %326 : vector<16x128xf32>
    %328 = arith.addf %315, %327 : vector<16x128xf32>
    %c0_155 = arith.constant 0 : index
    %c3200 = arith.constant 3200 : index
    %329 = vector.load %arg5[%c0_155, %c3200] : memref<32x4096xf32, #tpu.memory_space<vmem>>, vector<32x128xf32>
    %cst_156 = arith.constant dense<0.000000e+00> : vector<16x128xf32>
    %330 = tpu.matmul %0, %329, %cst_156 {dimension_numbers = #tpu.dot_dimension_numbers<[1], [0], [0], [1], [0, 0, 1, 1], [], []>} : vector<16x32xf32>, vector<32x128xf32>, vector<16x128xf32> -> vector<16x128xf32>
    %c0_157 = arith.constant 0 : index
    %c3200_158 = arith.constant 3200 : index
    %331 = vector.load %arg6[%c0_157, %c3200_158] : memref<1x4096xf32, #tpu.memory_space<vmem>>, vector<1x128xf32>
    %332 = vector.broadcast %331 : vector<1x128xf32> to vector<16x128xf32>
    %333 = arith.addf %330, %332 : vector<16x128xf32>
    %c0_159 = arith.constant 0 : index
    %c0_160 = arith.constant 0 : index
    %c25 = arith.constant 25 : index
    %334 = vector.load %arg4[%c0_159, %c0_160, %c25] : memref<1x16x32xf32, #tpu.memory_space<vmem>>, vector<1x16x1xf32>
    %335 = vector.shape_cast %334 : vector<1x16x1xf32> to vector<16x1xf32>
    %336 = arith.addf %323, %333 : vector<16x128xf32>
    %337 = arith.mulf %333, %333 : vector<16x128xf32>
    %338 = arith.addf %325, %337 : vector<16x128xf32>
    %339 = vector.broadcast %335 : vector<16x1xf32> to vector<16x128xf32>
    %340 = arith.mulf %333, %339 : vector<16x128xf32>
    %341 = arith.addf %328, %340 : vector<16x128xf32>
    %c0_161 = arith.constant 0 : index
    %c3328 = arith.constant 3328 : index
    %342 = vector.load %arg5[%c0_161, %c3328] : memref<32x4096xf32, #tpu.memory_space<vmem>>, vector<32x128xf32>
    %cst_162 = arith.constant dense<0.000000e+00> : vector<16x128xf32>
    %343 = tpu.matmul %0, %342, %cst_162 {dimension_numbers = #tpu.dot_dimension_numbers<[1], [0], [0], [1], [0, 0, 1, 1], [], []>} : vector<16x32xf32>, vector<32x128xf32>, vector<16x128xf32> -> vector<16x128xf32>
    %c0_163 = arith.constant 0 : index
    %c3328_164 = arith.constant 3328 : index
    %344 = vector.load %arg6[%c0_163, %c3328_164] : memref<1x4096xf32, #tpu.memory_space<vmem>>, vector<1x128xf32>
    %345 = vector.broadcast %344 : vector<1x128xf32> to vector<16x128xf32>
    %346 = arith.addf %343, %345 : vector<16x128xf32>
    %c0_165 = arith.constant 0 : index
    %c0_166 = arith.constant 0 : index
    %c26 = arith.constant 26 : index
    %347 = vector.load %arg4[%c0_165, %c0_166, %c26] : memref<1x16x32xf32, #tpu.memory_space<vmem>>, vector<1x16x1xf32>
    %348 = vector.shape_cast %347 : vector<1x16x1xf32> to vector<16x1xf32>
    %349 = arith.addf %336, %346 : vector<16x128xf32>
    %350 = arith.mulf %346, %346 : vector<16x128xf32>
    %351 = arith.addf %338, %350 : vector<16x128xf32>
    %352 = vector.broadcast %348 : vector<16x1xf32> to vector<16x128xf32>
    %353 = arith.mulf %346, %352 : vector<16x128xf32>
    %354 = arith.addf %341, %353 : vector<16x128xf32>
    %c0_167 = arith.constant 0 : index
    %c3456 = arith.constant 3456 : index
    %355 = vector.load %arg5[%c0_167, %c3456] : memref<32x4096xf32, #tpu.memory_space<vmem>>, vector<32x128xf32>
    %cst_168 = arith.constant dense<0.000000e+00> : vector<16x128xf32>
    %356 = tpu.matmul %0, %355, %cst_168 {dimension_numbers = #tpu.dot_dimension_numbers<[1], [0], [0], [1], [0, 0, 1, 1], [], []>} : vector<16x32xf32>, vector<32x128xf32>, vector<16x128xf32> -> vector<16x128xf32>
    %c0_169 = arith.constant 0 : index
    %c3456_170 = arith.constant 3456 : index
    %357 = vector.load %arg6[%c0_169, %c3456_170] : memref<1x4096xf32, #tpu.memory_space<vmem>>, vector<1x128xf32>
    %358 = vector.broadcast %357 : vector<1x128xf32> to vector<16x128xf32>
    %359 = arith.addf %356, %358 : vector<16x128xf32>
    %c0_171 = arith.constant 0 : index
    %c0_172 = arith.constant 0 : index
    %c27 = arith.constant 27 : index
    %360 = vector.load %arg4[%c0_171, %c0_172, %c27] : memref<1x16x32xf32, #tpu.memory_space<vmem>>, vector<1x16x1xf32>
    %361 = vector.shape_cast %360 : vector<1x16x1xf32> to vector<16x1xf32>
    %362 = arith.addf %349, %359 : vector<16x128xf32>
    %363 = arith.mulf %359, %359 : vector<16x128xf32>
    %364 = arith.addf %351, %363 : vector<16x128xf32>
    %365 = vector.broadcast %361 : vector<16x1xf32> to vector<16x128xf32>
    %366 = arith.mulf %359, %365 : vector<16x128xf32>
    %367 = arith.addf %354, %366 : vector<16x128xf32>
    %c0_173 = arith.constant 0 : index
    %c3584 = arith.constant 3584 : index
    %368 = vector.load %arg5[%c0_173, %c3584] : memref<32x4096xf32, #tpu.memory_space<vmem>>, vector<32x128xf32>
    %cst_174 = arith.constant dense<0.000000e+00> : vector<16x128xf32>
    %369 = tpu.matmul %0, %368, %cst_174 {dimension_numbers = #tpu.dot_dimension_numbers<[1], [0], [0], [1], [0, 0, 1, 1], [], []>} : vector<16x32xf32>, vector<32x128xf32>, vector<16x128xf32> -> vector<16x128xf32>
    %c0_175 = arith.constant 0 : index
    %c3584_176 = arith.constant 3584 : index
    %370 = vector.load %arg6[%c0_175, %c3584_176] : memref<1x4096xf32, #tpu.memory_space<vmem>>, vector<1x128xf32>
    %371 = vector.broadcast %370 : vector<1x128xf32> to vector<16x128xf32>
    %372 = arith.addf %369, %371 : vector<16x128xf32>
    %c0_177 = arith.constant 0 : index
    %c0_178 = arith.constant 0 : index
    %c28 = arith.constant 28 : index
    %373 = vector.load %arg4[%c0_177, %c0_178, %c28] : memref<1x16x32xf32, #tpu.memory_space<vmem>>, vector<1x16x1xf32>
    %374 = vector.shape_cast %373 : vector<1x16x1xf32> to vector<16x1xf32>
    %375 = arith.addf %362, %372 : vector<16x128xf32>
    %376 = arith.mulf %372, %372 : vector<16x128xf32>
    %377 = arith.addf %364, %376 : vector<16x128xf32>
    %378 = vector.broadcast %374 : vector<16x1xf32> to vector<16x128xf32>
    %379 = arith.mulf %372, %378 : vector<16x128xf32>
    %380 = arith.addf %367, %379 : vector<16x128xf32>
    %c0_179 = arith.constant 0 : index
    %c3712 = arith.constant 3712 : index
    %381 = vector.load %arg5[%c0_179, %c3712] : memref<32x4096xf32, #tpu.memory_space<vmem>>, vector<32x128xf32>
    %cst_180 = arith.constant dense<0.000000e+00> : vector<16x128xf32>
    %382 = tpu.matmul %0, %381, %cst_180 {dimension_numbers = #tpu.dot_dimension_numbers<[1], [0], [0], [1], [0, 0, 1, 1], [], []>} : vector<16x32xf32>, vector<32x128xf32>, vector<16x128xf32> -> vector<16x128xf32>
    %c0_181 = arith.constant 0 : index
    %c3712_182 = arith.constant 3712 : index
    %383 = vector.load %arg6[%c0_181, %c3712_182] : memref<1x4096xf32, #tpu.memory_space<vmem>>, vector<1x128xf32>
    %384 = vector.broadcast %383 : vector<1x128xf32> to vector<16x128xf32>
    %385 = arith.addf %382, %384 : vector<16x128xf32>
    %c0_183 = arith.constant 0 : index
    %c0_184 = arith.constant 0 : index
    %c29 = arith.constant 29 : index
    %386 = vector.load %arg4[%c0_183, %c0_184, %c29] : memref<1x16x32xf32, #tpu.memory_space<vmem>>, vector<1x16x1xf32>
    %387 = vector.shape_cast %386 : vector<1x16x1xf32> to vector<16x1xf32>
    %388 = arith.addf %375, %385 : vector<16x128xf32>
    %389 = arith.mulf %385, %385 : vector<16x128xf32>
    %390 = arith.addf %377, %389 : vector<16x128xf32>
    %391 = vector.broadcast %387 : vector<16x1xf32> to vector<16x128xf32>
    %392 = arith.mulf %385, %391 : vector<16x128xf32>
    %393 = arith.addf %380, %392 : vector<16x128xf32>
    %c0_185 = arith.constant 0 : index
    %c3840 = arith.constant 3840 : index
    %394 = vector.load %arg5[%c0_185, %c3840] : memref<32x4096xf32, #tpu.memory_space<vmem>>, vector<32x128xf32>
    %cst_186 = arith.constant dense<0.000000e+00> : vector<16x128xf32>
    %395 = tpu.matmul %0, %394, %cst_186 {dimension_numbers = #tpu.dot_dimension_numbers<[1], [0], [0], [1], [0, 0, 1, 1], [], []>} : vector<16x32xf32>, vector<32x128xf32>, vector<16x128xf32> -> vector<16x128xf32>
    %c0_187 = arith.constant 0 : index
    %c3840_188 = arith.constant 3840 : index
    %396 = vector.load %arg6[%c0_187, %c3840_188] : memref<1x4096xf32, #tpu.memory_space<vmem>>, vector<1x128xf32>
    %397 = vector.broadcast %396 : vector<1x128xf32> to vector<16x128xf32>
    %398 = arith.addf %395, %397 : vector<16x128xf32>
    %c0_189 = arith.constant 0 : index
    %c0_190 = arith.constant 0 : index
    %c30 = arith.constant 30 : index
    %399 = vector.load %arg4[%c0_189, %c0_190, %c30] : memref<1x16x32xf32, #tpu.memory_space<vmem>>, vector<1x16x1xf32>
    %400 = vector.shape_cast %399 : vector<1x16x1xf32> to vector<16x1xf32>
    %401 = arith.addf %388, %398 : vector<16x128xf32>
    %402 = arith.mulf %398, %398 : vector<16x128xf32>
    %403 = arith.addf %390, %402 : vector<16x128xf32>
    %404 = vector.broadcast %400 : vector<16x1xf32> to vector<16x128xf32>
    %405 = arith.mulf %398, %404 : vector<16x128xf32>
    %406 = arith.addf %393, %405 : vector<16x128xf32>
    %c0_191 = arith.constant 0 : index
    %c3968 = arith.constant 3968 : index
    %407 = vector.load %arg5[%c0_191, %c3968] : memref<32x4096xf32, #tpu.memory_space<vmem>>, vector<32x128xf32>
    %cst_192 = arith.constant dense<0.000000e+00> : vector<16x128xf32>
    %408 = tpu.matmul %0, %407, %cst_192 {dimension_numbers = #tpu.dot_dimension_numbers<[1], [0], [0], [1], [0, 0, 1, 1], [], []>} : vector<16x32xf32>, vector<32x128xf32>, vector<16x128xf32> -> vector<16x128xf32>
    %c0_193 = arith.constant 0 : index
    %c3968_194 = arith.constant 3968 : index
    %409 = vector.load %arg6[%c0_193, %c3968_194] : memref<1x4096xf32, #tpu.memory_space<vmem>>, vector<1x128xf32>
    %410 = vector.broadcast %409 : vector<1x128xf32> to vector<16x128xf32>
    %411 = arith.addf %408, %410 : vector<16x128xf32>
    %c0_195 = arith.constant 0 : index
    %c0_196 = arith.constant 0 : index
    %c31 = arith.constant 31 : index
    %412 = vector.load %arg4[%c0_195, %c0_196, %c31] : memref<1x16x32xf32, #tpu.memory_space<vmem>>, vector<1x16x1xf32>
    %413 = vector.shape_cast %412 : vector<1x16x1xf32> to vector<16x1xf32>
    %414 = arith.addf %401, %411 : vector<16x128xf32>
    %415 = arith.mulf %411, %411 : vector<16x128xf32>
    %416 = arith.addf %403, %415 : vector<16x128xf32>
    %417 = vector.broadcast %413 : vector<16x1xf32> to vector<16x128xf32>
    %418 = arith.mulf %411, %417 : vector<16x128xf32>
    %419 = arith.addf %406, %418 : vector<16x128xf32>
    %c0_i32 = arith.constant 0 : i32
    %420 = arith.cmpi eq, %arg2, %c0_i32 : i32
    %421 = arith.extui %420 : i1 to i32
    %c0_i32_197 = arith.constant 0 : i32
    %422 = arith.cmpi ne, %421, %c0_i32_197 : i32
    scf.if %422 {
      %cst_198 = arith.constant 3.125000e-02 : f32
      %423 = vector.broadcast %cst_198 : f32 to vector<16x128xf32>
      %424 = arith.mulf %414, %423 : vector<16x128xf32>
      %cst_199 = arith.constant 3.125000e-02 : f32
      %425 = vector.broadcast %cst_199 : f32 to vector<16x128xf32>
      %426 = arith.mulf %416, %425 : vector<16x128xf32>
      %427 = arith.mulf %424, %424 : vector<16x128xf32>
      %428 = arith.subf %426, %427 : vector<16x128xf32>
      %cst_200 = arith.constant 0.000000e+00 : f32
      %429 = vector.broadcast %cst_200 : f32 to vector<16x128xf32>
      %430 = arith.maximumf %428, %429 : vector<16x128xf32>
      %cst_201 = arith.constant dense<0.000000e+00> : vector<16xf32>
      %431 = vector.multi_reduction <add>, %0, %cst_201 [1] : vector<16x32xf32> to vector<16xf32>
      %432 = vector.shape_cast %431 : vector<16xf32> to vector<16x1xf32>
      %433 = vector.broadcast %432 : vector<16x1xf32> to vector<16x128xf32>
      %434 = arith.mulf %424, %433 : vector<16x128xf32>
      %435 = arith.subf %419, %434 : vector<16x128xf32>
      %cst_202 = arith.constant 9.99999974E-6 : f32
      %436 = vector.broadcast %cst_202 : f32 to vector<16x128xf32>
      %437 = arith.addf %430, %436 : vector<16x128xf32>
      %438 = math.rsqrt %437 : vector<16x128xf32>
      %439 = arith.mulf %435, %438 : vector<16x128xf32>
      %c0_203 = arith.constant 0 : index
      %c0_204 = arith.constant 0 : index
      %440 = vector.load %arg7[%c0_203, %c0_204] : memref<16x128xf32, #tpu.memory_space<vmem>>, vector<16x128xf32>
      %441 = arith.addf %439, %440 : vector<16x128xf32>
      %c0_205 = arith.constant 0 : index
      %c0_206 = arith.constant 0 : index
      %442 = vector.load %arg8[%c0_205, %c0_206] : memref<16x128xf32, #tpu.memory_space<vmem>>, vector<16x128xf32>
      tpu.vector_store %arg8[%c0_205, %c0_206], %441 {strides = array<i32>} : memref<16x128xf32, #tpu.memory_space<vmem>>, vector<16x128xf32>,
    } else {
    }
    return
  }
  func.func @transform_0(%arg0: i32, %arg1: i32, %arg2: i32) -> (i32, i32) {
    %c0_i32 = arith.constant 0 : i32
    %c0_i32_0 = arith.constant 0 : i32
    return %arg1, %c0_i32 : i32, i32
  }
  func.func @transform_1(%arg0: i32, %arg1: i32, %arg2: i32) -> (i32, i32, i32) {
    %c0_i32 = arith.constant 0 : i32
    %c0_i32_0 = arith.constant 0 : i32
    return %arg2, %arg1, %c0_i32 : i32, i32, i32
  }
  func.func @transform_2(%arg0: i32, %arg1: i32, %arg2: i32) -> (i32, i32) {
    %c1_i32 = arith.constant 1 : i32
    %0 = arith.muli %arg0, %c1_i32 : i32
    %1 = arith.addi %0, %arg2 : i32
    %c0_i32 = arith.constant 0 : i32
    %c0_i32_0 = arith.constant 0 : i32
    return %c0_i32, %1 : i32, i32
  }
  func.func @transform_3(%arg0: i32, %arg1: i32, %arg2: i32) -> (i32, i32) {
    %c1_i32 = arith.constant 1 : i32
    %0 = arith.muli %arg0, %c1_i32 : i32
    %1 = arith.addi %0, %arg2 : i32
    %c0_i32 = arith.constant 0 : i32
    %c0_i32_0 = arith.constant 0 : i32
    return %c0_i32, %1 : i32, i32
  }
  func.func @transform_4(%arg0: i32, %arg1: i32, %arg2: i32) -> (i32, i32) {
    %c0_i32 = arith.constant 0 : i32
    return %arg1, %arg0 : i32, i32
  }
  func.func @transform_5(%arg0: i32, %arg1: i32, %arg2: i32) -> (i32, i32) {
    %c0_i32 = arith.constant 0 : i32
    return %arg1, %arg0 : i32, i32
  }
}

</mosaic_0001>

<bundles_post_ra>
// kernel: tpu_custom_call.1
= control target key start
LH: loop header
LB: loop body
LE: loop exit
PB: predicated region body
PF: predicated region fallthrough
CT: control target
= control target key end

     0   :  { %10 = vsyncpa [#allocation3], 0  ;;  %s5128_s0 = inlined_call_operand.hbm [shape: f32[16,32], index: 0, kind: input, shape index: {}]   ;;  %s5129_s1 = inlined_call_operand.hbm [shape: f32[1,16,32], index: 1, kind: input, shape index: {}]   ;;  %s5130_s2 = inlined_call_operand.hbm [shape: f32[32,4096], index: 2, kind: input, shape index: {}]   ;;  %s5131_s3 = inlined_call_operand.hbm [shape: f32[1,4096], index: 3, kind: input, shape index: {}]   ;;  %s5132_s4 = inlined_call_operand.hbm [shape: f32[16,128], index: 4, kind: input, shape index: {}]   ;;  %s5133_s5 = inlined_call_operand.hbm [shape: f32[16,128], index: 5, kind: output, shape index: {}]  }
   0x1   :  { %11 = vsyncpa [#allocation6], 0 }
   0x2   :  { %12 = vsyncpa [#allocation9], 0 }
   0x3   :  { %13 = vsyncpa [#allocation4], 0  ;;  %s4632_s18 = smov [#allocation5]   ;;  %s4633_s20 = smov [#allocation8]  }
   0x4   :  { %s31_s19 = sshll.u32 %s4632_s18, 4  ;;  %s64_s21 = sshll.u32 %s4633_s20, 4  ;;  %s32_s19 = int_to_ptr.vmem [resolvable:$true] %s31_s19  ;;  %s65_s21 = int_to_ptr.vmem [resolvable:$true] %s64_s21 }
   0x5   :  { %s4492_s24 = scalar_lea.hbm %s5129_s1, 256 }
   0x6   :  { %p4493_p0 = scmp.ne.s32.totalorder %s5129_s1, %s4492_s24  ;;  %p4496_p1 = scmp.lt.u32.totalorder %s4492_s24, %s5129_s1 }
   0x8   :  { %p4498_p2 = pnand %p4496_p1, %p4493_p0 }
   0xa   :  { %4501 = shalt.err (!%p4498_p2)
}
   0xb   :  { %s4502_s29 = scalar_lea.vmem %s32_s19, 256  ;;  %p4507_p4 = scmp.lt.s32.totalorder %s32_s19, %s32_s19 }
   0xc   :  { %p4503_p3 = scmp.ne.s32.totalorder %s32_s19, %s4502_s29  ;;  %p4508_p5 = scmp.lt.s32.totalorder %s4502_s29, %s4502_s29 }
   0xe   :  { %p4509_p6 = por %p4508_p5, %p4507_p4 }
  0x10   :  { %p4510_p7 = pnand %p4509_p6, %p4503_p3 }
  0x12   :  { %4513 = shalt.err (!%p4510_p7)
}
  0x13   :  { %s4634_s30 = smov 128   ;;  %s4635_s6 = smov 8  }
  0x14   :  { %37 = dma.hbm_to_vmem [thread:$0]  %s5129_s1, 256, %s32_s19, [#allocation6], %s4634_s30, %s4634_s30, %s4635_s6  }
  0x15   :  { %s4514_s11 = scalar_lea.hbm %s5131_s3, 512 }
  0x16   :  { %p4515_p8 = scmp.ne.s32.totalorder %s5131_s3, %s4514_s11  ;;  %p4518_p9 = scmp.lt.u32.totalorder %s4514_s11, %s5131_s3 }
  0x18   :  { %p4520_p10 = pnand %p4518_p9, %p4515_p8 }
  0x1a   :  { %4523 = shalt.err (!%p4520_p10)
}
  0x1b   :  { %s4524_s16 = scalar_lea.vmem %s65_s21, 512  ;;  %p4529_p12 = scmp.lt.s32.totalorder %s65_s21, %s65_s21 }
  0x1c   :  { %p4525_p11 = scmp.ne.s32.totalorder %s65_s21, %s4524_s16  ;;  %p4530_p13 = scmp.lt.s32.totalorder %s4524_s16, %s4524_s16 }
  0x1e   :  { %p4531_p0 = por %p4530_p13, %p4529_p12 }
  0x20   :  { %p4532_p1 = pnand %p4531_p0, %p4525_p11 }
  0x22   :  { %4535 = shalt.err (!%p4532_p1)
}
  0x23   :  { %67 = dma.hbm_to_vmem [thread:$0]  %s5131_s3, 512, %s65_s21, [#allocation9]  }
  0x24   :  { %s4636_s18 = smov [#allocation2]   ;;  %s4637_s20 = smov [#allocation7]  }
  0x25   :  { %s19_s19 = sshll.u32 %s4636_s18, 4  ;;  %s47_s22 = sshll.u32 %s4637_s20, 4  ;;  %s20_s19 = int_to_ptr.vmem [resolvable:$true] %s19_s19  ;;  %s4731_s22 = int_to_ptr.vmem [resolvable:$true] %s47_s22 }
  0x26   :  { %s4536_s25 = scalar_lea.hbm %s5128_s0, 256 }
  0x27   :  { %p4537_p2 = scmp.ne.s32.totalorder %s5128_s0, %s4536_s25  ;;  %p4540_p3 = scmp.lt.u32.totalorder %s4536_s25, %s5128_s0 }
  0x29   :  { %p4542_p4 = pnand %p4540_p3, %p4537_p2 }
  0x2b   :  { %4545 = shalt.err (!%p4542_p4)
}
  0x2c   :  { %s4546_s3 = scalar_lea.vmem %s20_s19, 256  ;;  %p4551_p6 = scmp.lt.s32.totalorder %s20_s19, %s20_s19 }
  0x2d   :  { %p4547_p5 = scmp.ne.s32.totalorder %s20_s19, %s4546_s3  ;;  %p4552_p7 = scmp.lt.s32.totalorder %s4546_s3, %s4546_s3 }
  0x2f   :  { %p4553_p8 = por %p4552_p7, %p4551_p6 }
  0x31   :  { %p4554_p9 = pnand %p4553_p8, %p4547_p5 }
  0x33   :  { %4557 = shalt.err (!%p4554_p9)
}
  0x34   :  { %25 = dma.hbm_to_vmem [thread:$0]  %s5128_s0, 256, %s20_s19, [#allocation3], %s4634_s30, %s4634_s30, %s4635_s6  }
  0x35   :  { %s4558_s10 = scalar_lea.hbm %s5130_s2, 16384 }
  0x36   :  { %p4559_p10 = scmp.ne.s32.totalorder %s5130_s2, %s4558_s10  ;;  %p4562_p11 = scmp.lt.u32.totalorder %s4558_s10, %s5130_s2 }
  0x38   :  { %p4564_p12 = pnand %p4562_p11, %p4559_p10 }
  0x3a   :  { %4567 = shalt.err (!%p4564_p12)
}
  0x3b   :  { %s4568_s15 = scalar_lea.vmem %s4731_s22, 16384  ;;  %p4573_p0 = scmp.lt.s32.totalorder %s4731_s22, %s4731_s22 }
  0x3c   :  { %p4569_p13 = scmp.ne.s32.totalorder %s4731_s22, %s4568_s15  ;;  %p4574_p1 = scmp.lt.s32.totalorder %s4568_s15, %s4568_s15 }
  0x3e   :  { %p4575_p2 = por %p4574_p1, %p4573_p0 }
  0x40   :  { %p4576_p3 = pnand %p4575_p2, %p4569_p13 }
  0x42   :  { %4579 = shalt.err (!%p4576_p3)
}
  0x43   :  { %s4638_s0 = smov 4096   ;;  %s4639_s16 = smov 256  }
  0x44   :  { %53 = dma.hbm_to_vmem [thread:$0]  %s5130_s2, 16384, %s4731_s22, [#allocation6], %s4638_s0, %s4638_s0, %s4639_s16  }
  0x45   :  { %s4640_s18 = smov [#allocation10]   ;;  %s4580_s24 = scalar_lea.hbm %s5132_s4, 256 }
  0x46   :  { %s73_s19 = sshll.u32 %s4640_s18, 4  ;;  %p4581_p4 = scmp.ne.s32.totalorder %s5132_s4, %s4580_s24  ;;  %s74_s19 = int_to_ptr.vmem [resolvable:$true] %s73_s19 }
  0x47   :  { %p4584_p5 = scmp.lt.u32.totalorder %s4580_s24, %s5132_s4 }
  0x49   :  { %p4586_p6 = pnand %p4584_p5, %p4581_p4 }
  0x4b   :  { %4589 = shalt.err (!%p4586_p6)
}
  0x4c   :  { %s4590_s29 = scalar_lea.vmem %s74_s19, 256  ;;  %p4595_p8 = scmp.lt.s32.totalorder %s74_s19, %s74_s19 }
  0x4d   :  { %p4591_p7 = scmp.ne.s32.totalorder %s74_s19, %s4590_s29  ;;  %p4596_p9 = scmp.lt.s32.totalorder %s4590_s29, %s4590_s29 }
  0x4f   :  { %p4597_p10 = por %p4596_p9, %p4595_p8 }
  0x51   :  { %p4598_p11 = pnand %p4597_p10, %p4591_p7 }
  0x53   :  { %4601 = shalt.err (!%p4598_p11)
}
  0x54   :  { %79 = dma.hbm_to_vmem [thread:$0]  %s5132_s4, 256, %s74_s19, [#allocation9], %s4634_s30, %s4634_s30, %s4635_s6  }
  0x55   :  { %4624 = dma.done.wait [#allocation3], 256  }
  0x56   :  { %4625 = vsyncadd [#allocation3], 4294967040 }
  0x57   :  { %4626 = dma.done.wait [#allocation6], 16640  }
  0x58   :  { %4627 = vsyncadd [#allocation6], 4294950656 }
  0x59   :  { %4628 = dma.done.wait [#allocation9], 768  }
  0x5a   :  { %4629 = vsyncadd [#allocation9], 4294966528  ;;  %v4641_v0 = vmov 1   ;;  %v4642_v1 = vmov 0   ;;  %v4780_v2 = vld [vmem:[#allocation5] sm:$0xff]  ;;  %v101_v3 = vld [vmem:[#allocation7] sm:$0xff] }
  0x5b   :  { %4434 = vset.pattern.permute.xlu1 %v4641_v0  ;;  %4433 = vset.pattern.permute.xlu0 %v4642_v1  ;;  %v102_v4 = vld [vmem:[#allocation7 + $0x100] sm:$0xff]  ;;  %v216_v6 = vld [vmem:[#allocation7 + $0x8] sm:$0xff]  ;;  %v4783_v8 = vld [vmem:[#allocation5 + $0x8] sm:$0xff]  ;;  %vm112_vm0 = vcmask 261120   ;;  %v4643_v28 = vmov 2   ;;  %v4644_v36 = vmov 3  }
  0x5c   :  { %309 = vperm.xlu1 %4434, %v4780_v2   ;;  %v4135_v5 = vpack.c.bf16 %v102_v4, %v101_v3  ;;  %v217_v7 = vld [vmem:[#allocation7 + $0x108] sm:$0xff]  ;;  %204 = vperm.xlu0 %4433, %v4780_v2   ;;  %v103_v10 = vld [vmem:[#allocation7 + $0x200] sm:$0xff]  ;;  %v320_v17 = vld [vmem:[#allocation7 + $0x10] sm:$0xff]  ;;  %v4645_v45 = vmov 4   ;;  %v4646_v59 = vmov 5   ;;  %s4673_s4 = smov [#allocation11]  }
  0x5d   :  { %v4143_v9 = vpack.c.bf16 %v217_v7, %v216_v6  ;;  %v104_v11 = vld [vmem:[#allocation7 + $0x300] sm:$0xff]  ;;  %v218_v12 = vld [vmem:[#allocation7 + $0x208] sm:$0xff]  ;;  %v321_v18 = vld [vmem:[#allocation7 + $0x110] sm:$0xff]  ;;  %s3481_s3 = sshll.u32 %s4673_s4, 4  ;;  %s3482_s3 = int_to_ptr.vmem [resolvable:$true] %s3481_s3 }
  0x5e   :  { %4136 = vmatprep.subr.bf16.mxu0 %v4135_v5  ;;  %v4139_v13 = vpack.c.bf16 %v104_v11, %v103_v10  ;;  %v219_v14 = vld [vmem:[#allocation7 + $0x308] sm:$0xff]  ;;  %v4786_v15 = vld [vmem:[#allocation2] sm:$0xff]  ;;  %v424_v19 = vld [vmem:[#allocation7 + $0x18] sm:$0xff]  ;;  %v4151_v21 = vpack.c.bf16 %v321_v18, %v320_v17  ;;  %s4602_s21 = scalar_lea.vmem %s3482_s3, 256  ;;  %p4607_p13 = scmp.lt.s32.totalorder %s3482_s3, %s3482_s3 }
  0x5f   :  { %4144 = vmatprep.subr.bf16.mxu1 %v4143_v9  ;;  %4138 = vmatpush3.bf16.msra.mxu0 %v4135_v5  ;;  %v4147_v16 = vpack.c.bf16 %v219_v14, %v218_v12  ;;  %v425_v20 = vld [vmem:[#allocation7 + $0x118] sm:$0xff]  ;;  %v322_v22 = vld [vmem:[#allocation7 + $0x210] sm:$0xff]  ;;  %v4793_v27 = vld [vmem:[#allocation2 + $0x8] sm:$0xff]  ;;  %v4647_v5 = vmov 6   ;;  %v4648_v14 = vmov 7   ;;  %p4603_p12 = scmp.ne.s32.totalorder %s3482_s3, %s4602_s21  ;;  %p4608_p0 = scmp.lt.s32.totalorder %s4602_s21, %s4602_s21 }
  0x60   :  { %4146 = vmatpush3.bf16.msra.mxu1 %v4143_v9  ;;  %313 = vperm.xlu1 %4434, %v4783_v8   ;;  %v323_v23 = vld [vmem:[#allocation7 + $0x310] sm:$0xff]  ;;  %v4159_v24 = vpack.c.bf16 %v425_v20, %v424_v19  ;;  %v426_v25 = vld [vmem:[#allocation7 + $0x218] sm:$0xff]  ;;  %v528_v31 = vld [vmem:[#allocation7 + $0x20] sm:$0xff] }
  0x61   :  { %4140 = vmatprep.subr.bf16.mxu0 %v4139_v13  ;;  %4148 = vmatprep.subr.bf16.mxu1 %v4147_v16  ;;  %v427_v26 = vld [vmem:[#allocation7 + $0x318] sm:$0xff]  ;;  %v4155_v29 = vpack.c.bf16 %v323_v23, %v322_v22  ;;  %v529_v32 = vld [vmem:[#allocation7 + $0x120] sm:$0xff]  ;;  %v632_v33 = vld [vmem:[#allocation7 + $0x28] sm:$0xff]  ;;  %p4609_p1 = por %p4608_p0, %p4607_p13 }
  0x62   :  { %3791 = vmatprep.mubr.msk.f32.mxu0 %vm112_vm0, %v4786_v15  ;;  %3802 = vmatprep.mubr.msk.f32.mxu1 %vm112_vm0, %v4786_v15  ;;  %v4163_v30 = vpack.c.bf16 %v427_v26, %v426_v25  ;;  %v633_v34 = vld [vmem:[#allocation7 + $0x128] sm:$0xff]  ;;  %v4167_v35 = vpack.c.bf16 %v529_v32, %v528_v31  ;;  %v530_v38 = vld [vmem:[#allocation7 + $0x220] sm:$0xff]  ;;  %v736_v44 = vld [vmem:[#allocation7 + $0x30] sm:$0xff] }
  0x63   :  { %4142 = vmatpush3.bf16.msra.mxu0 %v4139_v13  ;;  %209 = vperm.xlu0 %4433, %v4783_v8   ;;  %v4175_v37 = vpack.c.bf16 %v633_v34, %v632_v33  ;;  %v531_v39 = vld [vmem:[#allocation7 + $0x320] sm:$0xff]  ;;  %v634_v40 = vld [vmem:[#allocation7 + $0x228] sm:$0xff]  ;;  %v737_v46 = vld [vmem:[#allocation7 + $0x130] sm:$0xff]  ;;  %p4610_p2 = pnand %p4609_p1, %p4603_p12 }
  0x64   :  { %4150 = vmatpush3.bf16.msra.mxu1 %v4147_v16  ;;  %4436 = vset.pattern.permute.xlu1 %v4643_v28  ;;  %v635_v41 = vld [vmem:[#allocation7 + $0x328] sm:$0xff]  ;;  %v4171_v42 = vpack.c.bf16 %v531_v39, %v530_v38  ;;  %v840_v47 = vld [vmem:[#allocation7 + $0x38] sm:$0xff]  ;;  %v4183_v49 = vpack.c.bf16 %v737_v46, %v736_v44  ;;  %v738_v51 = vld [vmem:[#allocation7 + $0x230] sm:$0xff]  ;;  %v4650_v39 = vmov 9  }
  0x65   :  { %417 = vperm.xlu1 %4436, %v4783_v8   ;;  %4152 = vmatprep.subr.bf16.mxu0 %v4151_v21  ;;  %v4179_v43 = vpack.c.bf16 %v635_v41, %v634_v40  ;;  %v841_v48 = vld [vmem:[#allocation7 + $0x138] sm:$0xff]  ;;  %v739_v52 = vld [vmem:[#allocation7 + $0x330] sm:$0xff]  ;;  %v944_v57 = vld [vmem:[#allocation7 + $0x40] sm:$0xff] }
  0x66   :  { %3792 = vmatmul.mubr.msk.f32.vlgmr.msra.gmra.mrb[0].mxu0 %vm112_vm0, %v4793_v27  ;;  %4160 = vmatprep.subr.bf16.mxu1 %v4159_v24  ;;  %v4191_v50 = vpack.c.bf16 %v841_v48, %v840_v47  ;;  %v842_v53 = vld [vmem:[#allocation7 + $0x238] sm:$0xff]  ;;  %v4187_v55 = vpack.c.bf16 %v739_v52, %v738_v51  ;;  %v945_v58 = vld [vmem:[#allocation7 + $0x140] sm:$0xff]  ;;  %v1048_v60 = vld [vmem:[#allocation7 + $0x48] sm:$0xff]  ;;  %v4651_v48 = vmov 10  }
  0x67   :  { %3803 = vmatmul.mubr.msk.f32.vlgmr.msra.gmra.mrb[0].mxu1 %vm112_vm0, %v4793_v27  ;;  %4154 = vmatpush3.bf16.msra.mxu0 %v4151_v21  ;;  %v843_v54 = vld [vmem:[#allocation7 + $0x338] sm:$0xff]  ;;  %v1049_v61 = vld [vmem:[#allocation7 + $0x148] sm:$0xff]  ;;  %v4199_v62 = vpack.c.bf16 %v945_v58, %v944_v57  ;;  %v946_v63 = vld [vmem:[#allocation7 + $0x240] sm:$0xff] }
  0x68   :  { %4162 = vmatpush3.bf16.msra.mxu1 %v4159_v24  ;;  %4156 = vmatprep.subr.bf16.mxu0 %v4155_v29  ;;  %v4195_v56 = vpack.c.bf16 %v843_v54, %v842_v53  ;;  %v947_v0 = vld [vmem:[#allocation7 + $0x340] sm:$0xff]  ;;  %v4207_v1 = vpack.c.bf16 %v1049_v61, %v1048_v60  ;;  %v1050_v3 = vld [vmem:[#allocation7 + $0x248] sm:$0xff]  ;;  %v1152_v9 = vld [vmem:[#allocation7 + $0x50] sm:$0xff] }
  0x69   :  { %4437 = vset.pattern.permute.xlu1 %v4644_v36  ;;  %4164 = vmatprep.subr.bf16.mxu1 %v4163_v30  ;;  %v1051_v4 = vld [vmem:[#allocation7 + $0x348] sm:$0xff]  ;;  %v4203_v6 = vpack.c.bf16 %v947_v0, %v946_v63  ;;  %v1153_v10 = vld [vmem:[#allocation7 + $0x150] sm:$0xff]  ;;  %v1256_v11 = vld [vmem:[#allocation7 + $0x58] sm:$0xff] }
  0x6a   :  { %517 = vperm.xlu1 %4437, %v4780_v2   ;;  %3813 = vmatprep.mubr.msk.f32.mxu0 %vm112_vm0, %v4786_v15  ;;  %v4211_v7 = vpack.c.bf16 %v1051_v4, %v1050_v3  ;;  %v1257_v12 = vld [vmem:[#allocation7 + $0x158] sm:$0xff]  ;;  %v4215_v13 = vpack.c.bf16 %v1153_v10, %v1152_v9  ;;  %v1154_v17 = vld [vmem:[#allocation7 + $0x250] sm:$0xff]  ;;  %v1360_v23 = vld [vmem:[#allocation7 + $0x60] sm:$0xff] }
  0x6b   :  { %4158 = vmatpush3.bf16.msra.mxu0 %v4155_v29  ;;  %3824 = vmatprep.mubr.msk.f32.mxu1 %vm112_vm0, %v4786_v15  ;;  %v4223_v16 = vpack.c.bf16 %v1257_v12, %v1256_v11  ;;  %v1155_v18 = vld [vmem:[#allocation7 + $0x350] sm:$0xff]  ;;  %v1258_v19 = vld [vmem:[#allocation7 + $0x258] sm:$0xff]  ;;  %v1361_v24 = vld [vmem:[#allocation7 + $0x160] sm:$0xff] }
  0x6c   :  { %4166 = vmatpush3.bf16.msra.mxu1 %v4163_v30  ;;  %4168 = vmatprep.subr.bf16.mxu0 %v4167_v35  ;;  %v1259_v20 = vld [vmem:[#allocation7 + $0x358] sm:$0xff]  ;;  %v4219_v21 = vpack.c.bf16 %v1155_v18, %v1154_v17  ;;  %v1464_v25 = vld [vmem:[#allocation7 + $0x68] sm:$0xff]  ;;  %v4649_v30 = vmov 8   ;;  %v1362_v31 = vld [vmem:[#allocation7 + $0x260] sm:$0xff]  ;;  %v4654_v18 = vmov 13  }
  0x6d   :  { %4176 = vmatprep.subr.bf16.mxu1 %v4175_v37  ;;  %4435 = vset.pattern.permute.xlu0 %v4643_v28  ;;  %v4227_v22 = vpack.c.bf16 %v1259_v20, %v1258_v19  ;;  %v1465_v26 = vld [vmem:[#allocation7 + $0x168] sm:$0xff]  ;;  %v4231_v28 = vpack.c.bf16 %v1361_v24, %v1360_v23  ;;  %v1363_v32 = vld [vmem:[#allocation7 + $0x360] sm:$0xff]  ;;  %v1569_v38 = vld [vmem:[#allocation7 + $0x170] sm:$0xff] }
  0x6e   :  { %4439 = vset.pattern.permute.xlu1 %v4645_v45  ;;  %3814 = vmatmul.mubr.msk.f32.vlgmr.msra.gmra.mrb[2].mxu0 %vm112_vm0, %v4793_v27  ;;  %v4239_v29 = vpack.c.bf16 %v1465_v26, %v1464_v25  ;;  %v1466_v33 = vld [vmem:[#allocation7 + $0x268] sm:$0xff]  ;;  %v1672_v40 = vld [vmem:[#allocation7 + $0x78] sm:$0xff]  ;;  %v1571_v45 = vld [vmem:[#allocation7 + $0x370] sm:$0xff] }
  0x6f   :  { %3825 = vmatmul.mubr.msk.f32.vlgmr.msra.gmra.mrb[2].mxu1 %vm112_vm0, %v4793_v27  ;;  %621 = vperm.xlu1 %4439, %v4780_v2   ;;  %v1467_v34 = vld [vmem:[#allocation7 + $0x368] sm:$0xff]  ;;  %v1673_v41 = vld [vmem:[#allocation7 + $0x178] sm:$0xff]  ;;  %v1776_v51 = vld [vmem:[#allocation7 + $0x80] sm:$0xff] }
  0x70   :  { %4170 = vmatpush3.bf16.msra.mxu0 %v4167_v35  ;;  %4178 = vmatpush3.bf16.msra.mxu1 %v4175_v37  ;;  %v4235_v35 = vpack.c.bf16 %v1363_v32, %v1362_v31  ;;  %v1568_v37 = vld [vmem:[#allocation7 + $0x70] sm:$0xff]  ;;  %v4255_v44 = vpack.c.bf16 %v1673_v41, %v1672_v40  ;;  %v1674_v46 = vld [vmem:[#allocation7 + $0x278] sm:$0xff]  ;;  %v1777_v52 = vld [vmem:[#allocation7 + $0x180] sm:$0xff] }
  0x71   :  { %4172 = vmatprep.subr.bf16.mxu0 %v4171_v42  ;;  %4180 = vmatprep.subr.bf16.mxu1 %v4179_v43  ;;  %v1675_v47 = vld [vmem:[#allocation7 + $0x378] sm:$0xff]  ;;  %v1880_v53 = vld [vmem:[#allocation7 + $0x88] sm:$0xff]  ;;  %v1778_v57 = vld [vmem:[#allocation7 + $0x280] sm:$0xff] }
  0x72   :  { %3835 = vmatprep.mubr.msk.f32.mxu0 %vm112_vm0, %v4786_v15  ;;  %3846 = vmatprep.mubr.msk.f32.mxu1 %vm112_vm0, %v4786_v15  ;;  %v1881_v54 = vld [vmem:[#allocation7 + $0x188] sm:$0xff]  ;;  %v1779_v58 = vld [vmem:[#allocation7 + $0x380] sm:$0xff]  ;;  %v1984_v0 = vld [vmem:[#allocation7 + $0x90] sm:$0xff] }
  0x73   :  { %625 = vperm.xlu1 %4439, %v4783_v8   ;;  %413 = vperm.xlu0 %4435, %v4780_v2   ;;  %v1883_v60 = vld [vmem:[#allocation7 + $0x388] sm:$0xff]  ;;  %v4267_v61 = vpack.c.bf16 %v1779_v58, %v1778_v57  ;;  %v2088_v3 = vld [vmem:[#allocation7 + $0x98] sm:$0xff]  ;;  %v1986_v9 = vld [vmem:[#allocation7 + $0x290] sm:$0xff] }
  0x74   :  { %4174 = vmatpush3.bf16.msra.mxu0 %v4171_v42  ;;  %4182 = vmatpush3.bf16.msra.mxu1 %v4179_v43  ;;  %v4247_v42 = vpack.c.bf16 %v1569_v38, %v1568_v37  ;;  %v1570_v43 = vld [vmem:[#allocation7 + $0x270] sm:$0xff]  ;;  %v2089_v4 = vld [vmem:[#allocation7 + $0x198] sm:$0xff]  ;;  %v2193_v17 = vld [vmem:[#allocation7 + $0x1a0] sm:$0xff] }
  0x75   :  { %4184 = vmatprep.subr.bf16.mxu0 %v4183_v49  ;;  %4192 = vmatprep.subr.bf16.mxu1 %v4191_v50  ;;  %v1987_v10 = vld [vmem:[#allocation7 + $0x390] sm:$0xff]  ;;  %v2090_v11 = vld [vmem:[#allocation7 + $0x298] sm:$0xff]  ;;  %v2296_v19 = vld [vmem:[#allocation7 + $0xa8] sm:$0xff] }
  0x76   :  { %v2091_v12 = vld [vmem:[#allocation7 + $0x398] sm:$0xff]  ;;  %v2297_v20 = vld [vmem:[#allocation7 + $0x1a8] sm:$0xff]  ;;  %v2194_v23 = vld [vmem:[#allocation7 + $0x2a0] sm:$0xff] }
  0x77   :  { %3836 = vmatmul.mubr.msk.f32.vlgmr.msra.gmra.mrb[4].mxu0 %vm112_vm0, %v4793_v27  ;;  %3847 = vmatmul.mubr.msk.f32.vlgmr.msra.gmra.mrb[4].mxu1 %vm112_vm0, %v4793_v27  ;;  %v2195_v24 = vld [vmem:[#allocation7 + $0x3a0] sm:$0xff]  ;;  %v2298_v25 = vld [vmem:[#allocation7 + $0x2a8] sm:$0xff]  ;;  %v2401_v31 = vld [vmem:[#allocation7 + $0x1b0] sm:$0xff] }
  0x78   :  { %4441 = vset.pattern.permute.xlu1 %v4646_v59  ;;  %4186 = vmatpush3.bf16.msra.mxu0 %v4183_v49  ;;  %v4251_v49 = vpack.c.bf16 %v1571_v45, %v1570_v43  ;;  %v2299_v26 = vld [vmem:[#allocation7 + $0x3a8] sm:$0xff]  ;;  %v2504_v32 = vld [vmem:[#allocation7 + $0xb8] sm:$0xff]  ;;  %v2402_v37 = vld [vmem:[#allocation7 + $0x2b0] sm:$0xff] }
  0x79   :  { %4194 = vmatpush3.bf16.msra.mxu1 %v4191_v50  ;;  %729 = vperm.xlu1 %4441, %v4783_v8   ;;  %v4259_v50 = vpack.c.bf16 %v1675_v47, %v1674_v46  ;;  %v2403_v38 = vld [vmem:[#allocation7 + $0x3b0] sm:$0xff]  ;;  %v2507_v40 = vld [vmem:[#allocation7 + $0x3b8] sm:$0xff]  ;;  %v2609_v45 = vld [vmem:[#allocation7 + $0x1c0] sm:$0xff] }
  0x7a   :  { %4188 = vmatprep.subr.bf16.mxu0 %v4187_v55  ;;  %4196 = vmatprep.subr.bf16.mxu1 %v4195_v56  ;;  %v4315_v41 = vpack.c.bf16 %v2403_v38, %v2402_v37  ;;  %v2712_v46 = vld [vmem:[#allocation7 + $0xc8] sm:$0xff]  ;;  %v2816_v57 = vld [vmem:[#allocation7 + $0xd0] sm:$0xff]  ;;  %v4662_v38 = vmov 21  }
  0x7b   :  { %3857 = vmatprep.mubr.msk.f32.mxu0 %vm112_vm0, %v4786_v15  ;;  %3868 = vmatprep.mubr.msk.f32.mxu1 %vm112_vm0, %v4786_v15  ;;  %v2713_v47 = vld [vmem:[#allocation7 + $0x1c8] sm:$0xff]  ;;  %v2817_v58 = vld [vmem:[#allocation7 + $0x1d0] sm:$0xff] }
  0x7c   :  { %4190 = vmatpush3.bf16.msra.mxu0 %v4187_v55  ;;  %4438 = vset.pattern.permute.xlu0 %v4644_v36  ;;  %v4243_v36 = vpack.c.bf16 %v1467_v34, %v1466_v33  ;;  %v4263_v55 = vpack.c.bf16 %v1777_v52, %v1776_v51  ;;  %v2505_v33 = vld [vmem:[#allocation7 + $0x1b8] sm:$0xff]  ;;  %v4655_v34 = vmov 14   ;;  %v4657_v51 = vmov 16   ;;  %v2611_v52 = vld [vmem:[#allocation7 + $0x3c0] sm:$0xff] }
  0x7d   :  { %4198 = vmatpush3.bf16.msra.mxu1 %v4195_v56  ;;  %4442 = vset.pattern.permute.xlu1 %v4647_v5  ;;  %v4271_v56 = vpack.c.bf16 %v1881_v54, %v1880_v53  ;;  %v2714_v53 = vld [vmem:[#allocation7 + $0x2c8] sm:$0xff] }
  0x7e   :  { %829 = vperm.xlu1 %4442, %v4780_v2   ;;  %4200 = vmatprep.subr.bf16.mxu0 %v4199_v62  ;;  %v2715_v54 = vld [vmem:[#allocation7 + $0x3c8] sm:$0xff] }
  0x7f   :  { %3858 = vmatmul.mubr.msk.f32.vlgmr.msra.gmra.mrb[6].mxu0 %vm112_vm0, %v4793_v27  ;;  %4208 = vmatprep.subr.bf16.mxu1 %v4207_v1 }
  0x80   :  { %3869 = vmatmul.mubr.msk.f32.vlgmr.msra.gmra.mrb[6].mxu1 %vm112_vm0, %v4793_v27  ;;  %4202 = vmatpush3.bf16.msra.mxu0 %v4199_v62  ;;  %v4652_v62 = vmov 11  }
  0x81   :  { %4210 = vmatpush3.bf16.msra.mxu1 %v4207_v1  ;;  %4204 = vmatprep.subr.bf16.mxu0 %v4203_v6  ;;  %v1985_v1 = vld [vmem:[#allocation7 + $0x190] sm:$0xff] }
  0x82   :  { %4444 = vset.pattern.permute.xlu1 %v4648_v14  ;;  %4212 = vmatprep.subr.bf16.mxu1 %v4211_v7  ;;  %v4291_v14 = vpack.c.bf16 %v2091_v12, %v2090_v11  ;;  %v3128_v12 = vld [vmem:[#allocation7 + $0xe8] sm:$0xff] }
  0x83   :  { %933 = vperm.xlu1 %4444, %v4780_v2   ;;  %3879 = vmatprep.mubr.msk.f32.mxu0 %vm112_vm0, %v4786_v15 }
  0x84   :  { %4206 = vmatpush3.bf16.msra.mxu0 %v4203_v6  ;;  %3890 = vmatprep.mubr.msk.f32.mxu1 %vm112_vm0, %v4786_v15  ;;  %v4287_v6 = vpack.c.bf16 %v2089_v4, %v2088_v3  ;;  %v2922_v3 = vld [vmem:[#allocation7 + $0x2d8] sm:$0xff] }
  0x85   :  { %4214 = vmatpush3.bf16.msra.mxu1 %v4211_v7  ;;  %4216 = vmatprep.subr.bf16.mxu0 %v4215_v13  ;;  %v4653_v7 = vmov 12   ;;  %v2923_v4 = vld [vmem:[#allocation7 + $0x3d8] sm:$0xff] }
  0x86   :  { %4224 = vmatprep.subr.bf16.mxu1 %v4223_v16  ;;  %521 = vperm.xlu0 %4438, %v4783_v8  }
  0x87   :  { %937 = vperm.xlu1 %4444, %v4783_v8   ;;  %3880 = vmatmul.mubr.msk.f32.vlgmr.msra.gmra.mrb[8].mxu0 %vm112_vm0, %v4793_v27 }
  0x88   :  { %3891 = vmatmul.mubr.msk.f32.vlgmr.msra.gmra.mrb[8].mxu1 %vm112_vm0, %v4793_v27  ;;  %4218 = vmatpush3.bf16.msra.mxu0 %v4215_v13  ;;  %v4283_v13 = vpack.c.bf16 %v1987_v10, %v1986_v9  ;;  %v3024_v9 = vld [vmem:[#allocation7 + $0xe0] sm:$0xff]  ;;  %v4659_v10 = vmov 18  }
  0x89   :  { %4226 = vmatpush3.bf16.msra.mxu1 %v4223_v16  ;;  %4220 = vmatprep.subr.bf16.mxu0 %v4219_v21  ;;  %v2192_v16 = vld [vmem:[#allocation7 + $0xa0] sm:$0xff] }
  0x8a   :  { %4228 = vmatprep.subr.bf16.mxu1 %v4227_v22  ;;  %3901 = vmatprep.mubr.msk.f32.mxu0 %vm112_vm0, %v4786_v15 }
  0x8b   :  { %4446 = vset.pattern.permute.xlu1 %v4649_v30  ;;  %3912 = vmatprep.mubr.msk.f32.mxu1 %vm112_vm0, %v4786_v15 }
  0x8c   :  { %1041 = vperm.xlu1 %4446, %v4783_v8   ;;  %4222 = vmatpush3.bf16.msra.mxu0 %v4219_v21  ;;  %v4295_v21 = vpack.c.bf16 %v2193_v17, %v2192_v16  ;;  %v3027_v16 = vld [vmem:[#allocation7 + $0x3e0] sm:$0xff] }
  0x8d   :  { %4230 = vmatpush3.bf16.msra.mxu1 %v4227_v22  ;;  %4232 = vmatprep.subr.bf16.mxu0 %v4231_v28  ;;  %v4303_v22 = vpack.c.bf16 %v2297_v20, %v2296_v19  ;;  %v3131_v19 = vld [vmem:[#allocation7 + $0x3e8] sm:$0xff]  ;;  %v4660_v20 = vmov 19  }
  0x8e   :  { %4240 = vmatprep.subr.bf16.mxu1 %v4239_v29  ;;  %4440 = vset.pattern.permute.xlu0 %v4646_v59  ;;  %v1882_v59 = vld [vmem:[#allocation7 + $0x288] sm:$0xff] }
  0x8f   :  { %3902 = vmatmul.mubr.msk.f32.vlgmr.msra.gmra.mrb[10].mxu0 %vm112_vm0, %v4793_v27  ;;  %725 = vperm.xlu0 %4440, %v4780_v2   ;;  %v4275_v63 = vpack.c.bf16 %v1883_v60, %v1882_v59  ;;  %v2920_v59 = vld [vmem:[#allocation7 + $0xd8] sm:$0xff] }
  0x90   :  { %3913 = vmatmul.mubr.msk.f32.vlgmr.msra.gmra.mrb[10].mxu1 %vm112_vm0, %v4793_v27  ;;  %4447 = vset.pattern.permute.xlu1 %v4650_v39  ;;  %v2921_v60 = vld [vmem:[#allocation7 + $0x1d8] sm:$0xff] }
  0x91   :  { %4234 = vmatpush3.bf16.msra.mxu0 %v4231_v28  ;;  %4242 = vmatpush3.bf16.msra.mxu1 %v4239_v29  ;;  %v4299_v28 = vpack.c.bf16 %v2195_v24, %v2194_v23  ;;  %v2400_v29 = vld [vmem:[#allocation7 + $0xb0] sm:$0xff] }
  0x92   :  { %1141 = vperm.xlu1 %4447, %v4780_v2   ;;  %4236 = vmatprep.subr.bf16.mxu0 %v4235_v35 }
  0x93   :  { %4244 = vmatprep.subr.bf16.mxu1 %v4243_v36  ;;  %3923 = vmatprep.mubr.msk.f32.mxu0 %vm112_vm0, %v4786_v15 }
  0x94   :  { %3934 = vmatprep.mubr.msk.f32.mxu1 %vm112_vm0, %v4786_v15  ;;  %4443 = vset.pattern.permute.xlu0 %v4647_v5  ;;  %v4279_v5 = vpack.c.bf16 %v1985_v1, %v1984_v0  ;;  %v2819_v0 = vld [vmem:[#allocation7 + $0x3d0] sm:$0xff]  ;;  %v4658_v1 = vmov 17  }
  0x95   :  { %4238 = vmatpush3.bf16.msra.mxu0 %v4235_v35  ;;  %4246 = vmatpush3.bf16.msra.mxu1 %v4243_v36  ;;  %v4311_v35 = vpack.c.bf16 %v2401_v31, %v2400_v29  ;;  %v4319_v36 = vpack.c.bf16 %v2505_v33, %v2504_v32  ;;  %v3234_v29 = vld [vmem:[#allocation7 + $0x2f0] sm:$0xff]  ;;  %v4661_v32 = vmov 20  }
  0x96   :  { %4449 = vset.pattern.permute.xlu1 %v4651_v48  ;;  %4248 = vmatprep.subr.bf16.mxu0 %v4247_v42 }
  0x97   :  { %1245 = vperm.xlu1 %4449, %v4780_v2   ;;  %4256 = vmatprep.subr.bf16.mxu1 %v4255_v44 }
  0x98   :  { %3924 = vmatmul.mubr.msk.f32.vlgmr.msra.gmra.mrb[12].mxu0 %vm112_vm0, %v4793_v27  ;;  %3935 = vmatmul.mubr.msk.f32.vlgmr.msra.gmra.mrb[12].mxu1 %vm112_vm0, %v4793_v27 }
  0x99   :  { %4250 = vmatpush3.bf16.msra.mxu0 %v4247_v42  ;;  %4258 = vmatpush3.bf16.msra.mxu1 %v4255_v44  ;;  %v4656_v42 = vmov 15   ;;  %v2608_v44 = vld [vmem:[#allocation7 + $0xc0] sm:$0xff] }
  0x9a   :  { %4252 = vmatprep.subr.bf16.mxu0 %v4251_v49  ;;  %4260 = vmatprep.subr.bf16.mxu1 %v4259_v50  ;;  %v4327_v48 = vpack.c.bf16 %v2609_v45, %v2608_v44  ;;  %v4665_v45 = vmov 24  }
  0x9b   :  { %1249 = vperm.xlu1 %4449, %v4783_v8   ;;  %3945 = vmatprep.mubr.msk.f32.mxu0 %vm112_vm0, %v4786_v15 }
  0x9c   :  { %3956 = vmatprep.mubr.msk.f32.mxu1 %vm112_vm0, %v4786_v15  ;;  %833 = vperm.xlu0 %4443, %v4783_v8  }
  0x9d   :  { %4254 = vmatpush3.bf16.msra.mxu0 %v4251_v49  ;;  %4262 = vmatpush3.bf16.msra.mxu1 %v4259_v50  ;;  %v4335_v49 = vpack.c.bf16 %v2713_v47, %v2712_v46  ;;  %v2610_v50 = vld [vmem:[#allocation7 + $0x2c0] sm:$0xff]  ;;  %v4666_v46 = vmov 25  }
  0x9e   :  { %4264 = vmatprep.subr.bf16.mxu0 %v4263_v55  ;;  %4272 = vmatprep.subr.bf16.mxu1 %v4271_v56 }
  0x9f   :  { %4451 = vset.pattern.permute.xlu1 %v4652_v62 }
  0xa0   :  { %1353 = vperm.xlu1 %4451, %v4783_v8   ;;  %3946 = vmatmul.mubr.msk.f32.vlgmr.msra.gmra.mrb[14].mxu0 %vm112_vm0, %v4793_v27 }
  0xa1   :  { %3957 = vmatmul.mubr.msk.f32.vlgmr.msra.gmra.mrb[14].mxu1 %vm112_vm0, %v4793_v27  ;;  %4266 = vmatpush3.bf16.msra.mxu0 %v4263_v55  ;;  %v4331_v55 = vpack.c.bf16 %v2611_v52, %v2610_v50  ;;  %v5010_v52 = vld [vmem:[#allocation5 + $0x8] sm:$0xff] }
  0xa2   :  { %4274 = vmatpush3.bf16.msra.mxu1 %v4271_v56  ;;  %4268 = vmatprep.subr.bf16.mxu0 %v4267_v61  ;;  %v4339_v56 = vpack.c.bf16 %v2715_v54, %v2714_v53  ;;  %v4669_v53 = vmov 29  }
  0xa3   :  { %4276 = vmatprep.subr.bf16.mxu1 %v4275_v63  ;;  %3967 = vmatprep.mubr.msk.f32.mxu0 %vm112_vm0, %v4786_v15 }
  0xa4   :  { %4452 = vset.pattern.permute.xlu1 %v4653_v7  ;;  %3978 = vmatprep.mubr.msk.f32.mxu1 %vm112_vm0, %v4786_v15 }
  0xa5   :  { %1453 = vperm.xlu1 %4452, %v4780_v2   ;;  %4270 = vmatpush3.bf16.msra.mxu0 %v4267_v61  ;;  %v4343_v61 = vpack.c.bf16 %v2817_v58, %v2816_v57 }
  0xa6   :  { %4278 = vmatpush3.bf16.msra.mxu1 %v4275_v63  ;;  %4280 = vmatprep.subr.bf16.mxu0 %v4279_v5  ;;  %v2818_v63 = vld [vmem:[#allocation7 + $0x2d0] sm:$0xff] }
  0xa7   :  { %4288 = vmatprep.subr.bf16.mxu1 %v4287_v6  ;;  %4445 = vset.pattern.permute.xlu0 %v4649_v30  ;;  %v4307_v30 = vpack.c.bf16 %v2299_v26, %v2298_v25  ;;  %v3336_v26 = vld [vmem:[#allocation7 + $0xf8] sm:$0xff] }
  0xa8   :  { %3968 = vmatmul.mubr.msk.f32.vlgmr.msra.gmra.mrb[16].mxu0 %vm112_vm0, %v4793_v27  ;;  %1037 = vperm.xlu0 %4445, %v4780_v2  }
  0xa9   :  { %3979 = vmatmul.mubr.msk.f32.vlgmr.msra.gmra.mrb[16].mxu1 %vm112_vm0, %v4793_v27  ;;  %4454 = vset.pattern.permute.xlu1 %v4654_v18  ;;  %v3130_v18 = vld [vmem:[#allocation7 + $0x2e8] sm:$0xff] }
  0xaa   :  { %4282 = vmatpush3.bf16.msra.mxu0 %v4279_v5  ;;  %4290 = vmatpush3.bf16.msra.mxu1 %v4287_v6  ;;  %v4347_v5 = vpack.c.bf16 %v2819_v0, %v2818_v63  ;;  %v4355_v6 = vpack.c.bf16 %v2923_v4, %v2922_v3  ;;  %v4371_v24 = vpack.c.bf16 %v3131_v19, %v3130_v18  ;;  %v3457_v0 = vsel %vm112_vm0, %v4793_v27, 0.0  ;;  %v3495_v4 = vld [vmem:[#allocation8] ss:$0 sm:$0xff] }
  0xab   :  { %1557 = vperm.xlu1 %4454, %v4780_v2   ;;  %4284 = vmatprep.subr.bf16.mxu0 %v4283_v13 }
  0xac   :  { %4292 = vmatprep.subr.bf16.mxu1 %v4291_v14  ;;  %3989 = vmatprep.mubr.msk.f32.mxu0 %vm112_vm0, %v4786_v15 }
  0xad   :  { %4000 = vmatprep.mubr.msk.f32.mxu1 %vm112_vm0, %v4786_v15  ;;  %4448 = vset.pattern.permute.xlu0 %v4650_v39  ;;  %v2506_v39 = vld [vmem:[#allocation7 + $0x2b8] sm:$0xff] }
  0xae   :  { %4286 = vmatpush3.bf16.msra.mxu0 %v4283_v13  ;;  %4294 = vmatpush3.bf16.msra.mxu1 %v4291_v14  ;;  %v4323_v43 = vpack.c.bf16 %v2507_v40, %v2506_v39  ;;  %v3129_v13 = vld [vmem:[#allocation7 + $0x1e8] sm:$0xff]  ;;  %v3026_v14 = vld [vmem:[#allocation7 + $0x2e0] sm:$0xff]  ;;  %v4663_v40 = vmov 22  }
  0xaf   :  { %1561 = vperm.xlu1 %4454, %v4783_v8   ;;  %4296 = vmatprep.subr.bf16.mxu0 %v4295_v21  ;;  %v4367_v17 = vpack.c.bf16 %v3129_v13, %v3128_v12  ;;  %v4363_v23 = vpack.c.bf16 %v3027_v16, %v3026_v14 }
  0xb0   :  { %4304 = vmatprep.subr.bf16.mxu1 %v4303_v22  ;;  %1145 = vperm.xlu0 %4448, %v4783_v8  }
  0xb1   :  { %3990 = vmatmul.mubr.msk.f32.vlgmr.msra.gmra.mrb[18].mxu0 %vm112_vm0, %v4793_v27  ;;  %4001 = vmatmul.mubr.msk.f32.vlgmr.msra.gmra.mrb[18].mxu1 %vm112_vm0, %v4793_v27 }
  0xb2   :  { %4298 = vmatpush3.bf16.msra.mxu0 %v4295_v21  ;;  %4306 = vmatpush3.bf16.msra.mxu1 %v4303_v22  ;;  %v3232_v21 = vld [vmem:[#allocation7 + $0xf0] sm:$0xff] }
  0xb3   :  { %4456 = vset.pattern.permute.xlu1 %v4655_v34  ;;  %4300 = vmatprep.subr.bf16.mxu0 %v4299_v28  ;;  %v3233_v22 = vld [vmem:[#allocation7 + $0x1f0] sm:$0xff] }
  0xb4   :  { %1665 = vperm.xlu1 %4456, %v4783_v8   ;;  %4308 = vmatprep.subr.bf16.mxu1 %v4307_v30  ;;  %v4375_v25 = vpack.c.bf16 %v3233_v22, %v3232_v21 }
  0xb5   :  { %4011 = vmatprep.mubr.msk.f32.mxu0 %vm112_vm0, %v4786_v15  ;;  %4022 = vmatprep.mubr.msk.f32.mxu1 %vm112_vm0, %v4786_v15 }
  0xb6   :  { %4302 = vmatpush3.bf16.msra.mxu0 %v4299_v28  ;;  %4310 = vmatpush3.bf16.msra.mxu1 %v4307_v30  ;;  %v3337_v28 = vld [vmem:[#allocation7 + $0x1f8] sm:$0xff]  ;;  %v3235_v30 = vld [vmem:[#allocation7 + $0x3f0] sm:$0xff] }
  0xb7   :  { %4312 = vmatprep.subr.bf16.mxu0 %v4311_v35  ;;  %4320 = vmatprep.subr.bf16.mxu1 %v4319_v36  ;;  %v4383_v31 = vpack.c.bf16 %v3337_v28, %v3336_v26  ;;  %v4379_v33 = vpack.c.bf16 %v3235_v30, %v3234_v29 }
  0xb8   :  { %4457 = vset.pattern.permute.xlu1 %v4656_v42  ;;  %4450 = vset.pattern.permute.xlu0 %v4652_v62  ;;  %v4351_v62 = vpack.c.bf16 %v2921_v60, %v2920_v59  ;;  %v4491_v59 = vld [vmem:[#allocation2] sm:$0xff] }
  0xb9   :  { %1765 = vperm.xlu1 %4457, %v4780_v2   ;;  %4012 = vmatmul.mubr.msk.f32.vlgmr.msra.gmra.mrb[20].mxu0 %vm112_vm0, %v4793_v27  ;;  %v3454_v60 = vsel %vm112_vm0, %v4491_v59, 0.0 }
  0xba   :  { %4023 = vmatmul.mubr.msk.f32.vlgmr.msra.gmra.mrb[20].mxu1 %vm112_vm0, %v4793_v27  ;;  %4314 = vmatpush3.bf16.msra.mxu0 %v4311_v35  ;;  %v3339_v35 = vld [vmem:[#allocation7 + $0x3f8] sm:$0xff] }
  0xbb   :  { %4322 = vmatpush3.bf16.msra.mxu1 %v4319_v36  ;;  %4316 = vmatprep.subr.bf16.mxu0 %v4315_v41 }
  0xbc   :  { %4324 = vmatprep.subr.bf16.mxu1 %v4323_v43  ;;  %4033 = vmatprep.mubr.msk.f32.mxu0 %vm112_vm0, %v4786_v15 }
  0xbd   :  { %4459 = vset.pattern.permute.xlu1 %v4657_v51  ;;  %4044 = vmatprep.mubr.msk.f32.mxu1 %vm112_vm0, %v4786_v15  ;;  %v4668_v51 = vmov 27  }
  0xbe   :  { %1869 = vperm.xlu1 %4459, %v4780_v2   ;;  %4318 = vmatpush3.bf16.msra.mxu0 %v4315_v41 }
  0xbf   :  { %4326 = vmatpush3.bf16.msra.mxu1 %v4323_v43  ;;  %4328 = vmatprep.subr.bf16.mxu0 %v4327_v48 }
  0xc0   :  { %4336 = vmatprep.subr.bf16.mxu1 %v4335_v49  ;;  %1349 = vperm.xlu0 %4450, %v4780_v2  }
  0xc1   :  { %4034 = vmatmul.mubr.msk.f32.vlgmr.msra.gmra.mrb[22].mxu0 %vm112_vm0, %v4793_v27 }
  0xc2   :  { %4045 = vmatmul.mubr.msk.f32.vlgmr.msra.gmra.mrb[22].mxu1 %vm112_vm0, %v4793_v27  ;;  %1873 = vperm.xlu1 %4459, %v4783_v8  }
  0xc3   :  { %4330 = vmatpush3.bf16.msra.mxu0 %v4327_v48  ;;  %4338 = vmatpush3.bf16.msra.mxu1 %v4335_v49  ;;  %v4667_v48 = vmov 26   ;;  %v5003_v49 = vld [vmem:[#allocation5] sm:$0xff] }
  0xc4   :  { %4332 = vmatprep.subr.bf16.mxu0 %v4331_v55  ;;  %4340 = vmatprep.subr.bf16.mxu1 %v4339_v56 }
  0xc5   :  { %4055 = vmatprep.mubr.msk.f32.mxu0 %vm112_vm0, %v4786_v15  ;;  %4066 = vmatprep.mubr.msk.f32.mxu1 %vm112_vm0, %v4786_v15 }
  0xc6   :  { %4461 = vset.pattern.permute.xlu1 %v4658_v1  ;;  %4453 = vset.pattern.permute.xlu0 %v4653_v7  ;;  %v3025_v7 = vld [vmem:[#allocation7 + $0x1e0] sm:$0xff] }
  0xc7   :  { %4334 = vmatpush3.bf16.msra.mxu0 %v4331_v55  ;;  %4342 = vmatpush3.bf16.msra.mxu1 %v4339_v56  ;;  %v4359_v11 = vpack.c.bf16 %v3025_v7, %v3024_v9  ;;  %v4670_v55 = vmov 28   ;;  %v4671_v9 = vmov 31  }
  0xc8   :  { %1977 = vperm.xlu1 %4461, %v4783_v8   ;;  %4344 = vmatprep.subr.bf16.mxu0 %v4343_v61 }
  0xc9   :  { %4352 = vmatprep.subr.bf16.mxu1 %v4351_v62  ;;  %1457 = vperm.xlu0 %4453, %v4783_v8  }
  0xca   :  { %4056 = vmatmul.mubr.msk.f32.vlgmr.msra.gmra.mrb[24].mxu0 %vm112_vm0, %v4793_v27  ;;  %4067 = vmatmul.mubr.msk.f32.vlgmr.msra.gmra.mrb[24].mxu1 %vm112_vm0, %v4793_v27 }
  0xcb   :  { %4346 = vmatpush3.bf16.msra.mxu0 %v4343_v61  ;;  %4354 = vmatpush3.bf16.msra.mxu1 %v4351_v62 }
  0xcc   :  { %4462 = vset.pattern.permute.xlu1 %v4659_v10  ;;  %4348 = vmatprep.subr.bf16.mxu0 %v4347_v5 }
  0xcd   :  { %2077 = vperm.xlu1 %4462, %v4780_v2   ;;  %4356 = vmatprep.subr.bf16.mxu1 %v4355_v6 }
  0xce   :  { %4455 = vset.pattern.permute.xlu0 %v4655_v34  ;;  %4077 = vmatprep.mubr.msk.f32.mxu0 %vm112_vm0, %v4786_v15  ;;  %v3338_v34 = vld [vmem:[#allocation7 + $0x2f8] sm:$0xff] }
  0xcf   :  { %4350 = vmatpush3.bf16.msra.mxu0 %v4347_v5  ;;  %4358 = vmatpush3.bf16.msra.mxu1 %v4355_v6  ;;  %v4387_v37 = vpack.c.bf16 %v3339_v35, %v3338_v34  ;;  %v3498_v5 = vld [vmem:[#allocation8 + $0x1] ss:$0 sm:$0xff] }
  0xd0   :  { %1661 = vperm.xlu0 %4455, %v4780_v2   ;;  %4088 = vmatprep.mubr.msk.f32.mxu1 %vm112_vm0, %v4786_v15 }
  0xd1   :  { %4464 = vset.pattern.permute.xlu1 %v4660_v20  ;;  %4360 = vmatprep.subr.bf16.mxu0 %v4359_v11 }
  0xd2   :  { %2181 = vperm.xlu1 %4464, %v4780_v2   ;;  %4078 = vmatmul.mubr.msk.f32.vlgmr.msra.gmra.mrb[26].mxu0 %vm112_vm0, %v4793_v27 }
  0xd3   :  { %4089 = vmatmul.mubr.msk.f32.vlgmr.msra.gmra.mrb[26].mxu1 %vm112_vm0, %v4793_v27  ;;  %4362 = vmatpush3.bf16.msra.mxu0 %v4359_v11 }
  0xd4   :  { %4368 = vmatprep.subr.bf16.mxu1 %v4367_v17  ;;  %4458 = vset.pattern.permute.xlu0 %v4656_v42 }
  0xd5   :  { %4370 = vmatpush3.bf16.msra.mxu1 %v4367_v17  ;;  %1769 = vperm.xlu0 %4458, %v4783_v8  }
  0xd6   :  { %2185 = vperm.xlu1 %4464, %v4783_v8   ;;  %4364 = vmatprep.subr.bf16.mxu0 %v4363_v23 }
  0xd7   :  { %4366 = vmatpush3.bf16.msra.mxu0 %v4363_v23  ;;  %4372 = vmatprep.subr.bf16.mxu1 %v4371_v24 }
  0xd8   :  { %4099 = vmatprep.mubr.msk.f32.mxu0 %vm112_vm0, %v4786_v15  ;;  %4376 = vmatprep.subr.bf16.mxu0 %v4375_v25 }
  0xd9   :  { %4374 = vmatpush3.bf16.msra.mxu1 %v4371_v24  ;;  %4460 = vset.pattern.permute.xlu0 %v4658_v1 }
  0xda   :  { %4466 = vset.pattern.permute.xlu1 %v4661_v32  ;;  %4100 = vmatmul.mubr.msk.f32.vlgmr.msra.gmra.mrb[28].mxu0 %vm112_vm0, %v4793_v27 }
  0xdb   :  { %2289 = vperm.xlu1 %4466, %v4783_v8   ;;  %1973 = vperm.xlu0 %4460, %v4780_v2   ;;  %v4965_v36 = vpop.permute.xlu1 %309  ;;  %v205_v1 = vpop.permute.xlu0 %204 }
  0xdc   :  { %4110 = vmatprep.mubr.msk.f32.mxu1 %vm112_vm0, %v4786_v15  ;;  %4378 = vmatpush3.bf16.msra.mxu0 %v4375_v25 }
  0xdd   :  { %4111 = vmatmul.mubr.msk.f32.vlgmr.msra.gmra.mrb[28].mxu1 %vm112_vm0, %v4793_v27  ;;  %4384 = vmatprep.subr.bf16.mxu1 %v4383_v31 }
  0xde   :  { %4386 = vmatpush3.bf16.msra.mxu1 %v4383_v31  ;;  %4380 = vmatprep.subr.bf16.mxu0 %v4379_v33 }
  0xdf   :  { %4467 = vset.pattern.permute.xlu1 %v4662_v38  ;;  %4463 = vset.pattern.permute.xlu0 %v4659_v10  ;;  %v4972_v39 = vpop.permute.xlu1 %313 }
  0xe0   :  { %4382 = vmatpush3.bf16.msra.mxu0 %v4379_v33  ;;  %2389 = vperm.xlu1 %4467, %v4780_v2  }
  0xe1   :  { %2081 = vperm.xlu0 %4463, %v4783_v8   ;;  %4388 = vmatprep.subr.bf16.mxu1 %v4387_v37 }
  0xe2   :  { %4121 = vmatprep.mubr.msk.f32.mxu0 %vm112_vm0, %v4786_v15  ;;  %4390 = vmatpush3.bf16.msra.mxu1 %v4387_v37  ;;  %v210_v6 = vpop.permute.xlu0 %209  ;;  %v3504_v37 = vld [vmem:[#allocation8 + $0x3] ss:$0 sm:$0xff] }
  0xe3   :  { %4122 = vmatmul.mubr.msk.f32.vlgmr.msra.gmra.mrb[30].mxu0 %vm112_vm0, %v4793_v27  ;;  %4132 = vmatprep.mubr.msk.f32.mxu1 %vm112_vm0, %v4786_v15  ;;  %v4664_v15 = vmov 23  }
  0xe4   :  { %4469 = vset.pattern.permute.xlu1 %v4663_v40  ;;  %v4982_v41 = vpop.permute.xlu1 %417 }
  0xe5   :  { %4465 = vset.pattern.permute.xlu0 %v4661_v32  ;;  %4133 = vmatmul.mubr.msk.f32.vlgmr.msra.gmra.mrb[30].mxu1 %vm112_vm0, %v4793_v27  ;;  %v3501_v32 = vld [vmem:[#allocation8 + $0x2] ss:$0 sm:$0xff] }
  0xe6   :  { %2493 = vperm.xlu1 %4469, %v4780_v2   ;;  %2285 = vperm.xlu0 %4465, %v4780_v2  }
  0xe9   :  { %v4988_v42 = vpop.permute.xlu1 %517 }
  0xea   :  { %2497 = vperm.xlu1 %4469, %v4783_v8   ;;  %4468 = vset.pattern.permute.xlu0 %v4662_v38 }
  0xeb   :  { %2393 = vperm.xlu0 %4468, %v4783_v8  }
  0xee   :  { %4471 = vset.pattern.permute.xlu1 %v4664_v15  ;;  %v4992_v43 = vpop.permute.xlu1 %621 }
  0xef   :  { %2601 = vperm.xlu1 %4471, %v4783_v8   ;;  %4470 = vset.pattern.permute.xlu0 %v4664_v15 }
  0xf0   :  { %2597 = vperm.xlu0 %4470, %v4780_v2  }
  0xf2   :  { %v4996_v44 = vpop.permute.xlu1 %625  ;;  %v414_v31 = vpop.permute.xlu0 %413 }
  0xf3   :  { %4472 = vset.pattern.permute.xlu1 %v4665_v45 }
  0xf4   :  { %2701 = vperm.xlu1 %4472, %v4780_v2   ;;  %4473 = vset.pattern.permute.xlu0 %v4665_v45 }
  0xf5   :  { %2705 = vperm.xlu0 %4473, %v4783_v8  }
  0xf8   :  { %4474 = vset.pattern.permute.xlu1 %v4666_v46  ;;  %v5000_v47 = vpop.permute.xlu1 %729 }
  0xf9   :  { %2805 = vperm.xlu1 %4474, %v4780_v2   ;;  %4475 = vset.pattern.permute.xlu0 %v4667_v48 }
  0xfa   :  { %2909 = vperm.xlu0 %4475, %v5003_v49  }
  0xfd   :  { %2809 = vperm.xlu1 %4474, %v4783_v8   ;;  %v5007_v50 = vpop.permute.xlu1 %829 }
  0xfe   :  { %4478 = vset.pattern.permute.xlu0 %v4668_v51 }
  0xff   :  { %3017 = vperm.xlu0 %4478, %v4783_v8  }
 0x101   :  { %4476 = vset.pattern.permute.xlu1 %v4667_v48 }
 0x102   :  { %2913 = vperm.xlu1 %4476, %v5010_v52   ;;  %v5013_v2 = vpop.permute.xlu1 %933 }
 0x103   :  { %4480 = vset.pattern.permute.xlu0 %v4669_v53 }
 0x106   :  { %4477 = vset.pattern.permute.xlu1 %v4668_v51  ;;  %v5015_v54 = vpop.permute.xlu1 %937 }
 0x107   :  { %3013 = vperm.xlu1 %4477, %v5003_v49  }
 0x10b   :  { %4479 = vset.pattern.permute.xlu1 %v4670_v55  ;;  %v5018_v56 = vpop.permute.xlu1 %1041 }
 0x10c   :  { %3117 = vperm.xlu1 %4479, %v5003_v49  }
 0x110   :  { %3121 = vperm.xlu1 %4479, %v5010_v52  }
 0x111   :  { %v5022_v8 = vpop.permute.xlu1 %1141 }
 0x114   :  { %4481 = vset.pattern.permute.xlu1 %v4669_v53 }
 0x116   :  { %v5024_v57 = vpop.permute.xlu1 %1245 }
 0x11a   :  { %v5026_v58 = vpop.permute.xlu1 %1249 }
 0x11e   :  { %3455 = vadd.xlane.f32.xlu0 %v3454_v60 }
 0x11f   :  { %v5029_v61 = vpop.permute.xlu1 %1353 }
 0x124   :  { %v5031_v62 = vpop.permute.xlu1 %1453 }
 0x12a   :  { %v5033_v63 = vpop.permute.xlu1 %1557 }
 0x12e   :  { %v5037_v3 = vpop.permute.xlu1 %1561 }
 0x133   :  { %v5041_v7 = vpop.permute.xlu1 %1665 }
 0x134   :  { %3458 = vadd.xlane.f32.xlu1 %v3457_v0  ;;  %3221 = vperm.xlu0 %4480, %v5003_v49  }
 0x138   :  { %4484 = vset.pattern.permute.xlu0 %v4671_v9  ;;  %v5045_v33 = vpop.permute.xlu1 %1765 }
 0x139   :  { %v3793_v10 = vpop.f32.mrb[0].mxu0 }
 0x13a   :  { %v191_v11 = vadd.f32 %v3793_v10, %v3495_v4  ;;  %v3804_v12 = vpop.f32.mrb[0].mxu1  ;;  %v185_v13 = vpop.f32.mrb[1].mxu0 }
 0x13b   :  { %v299_v14 = vadd.f32 %v3804_v12, %v3498_v5  ;;  %v186_v27 = vadd.f32 %v3495_v4, %v185_v13  ;;  %v293_v16 = vpop.f32.mrb[1].mxu1  ;;  %v522_v4 = vpop.permute.xlu0 %521 }
 0x13c   :  { %v199_v17 = vmul.f32 %v191_v11, %v191_v11  ;;  %v213_v18 = vmul.f32 %v210_v6, %v191_v11  ;;  %v294_v19 = vadd.f32 %v3498_v5, %v293_v16 }
 0x13d   :  { %v303_v20 = vadd.f32 %v299_v14, %v191_v11  ;;  %v305_v21 = vmul.f32 %v299_v14, %v299_v14  ;;  %v317_v22 = vmul.f32 %v4972_v39, %v299_v14  ;;  %v198_v23 = vmul.f32 %v186_v27, %v186_v27  ;;  %v5049_v5 = vpop.permute.xlu1 %1869 }
 0x13e   :  { %v212_v24 = vmul.f32 %v205_v1, %v186_v27  ;;  %v302_v25 = vadd.f32 %v294_v19, %v186_v27  ;;  %v304_v26 = vmul.f32 %v294_v19, %v294_v19  ;;  %v316_v28 = vmul.f32 %v4965_v36, %v294_v19  ;;  %v3510_v19 = vld [vmem:[#allocation8 + $0x5] ss:$0 sm:$0xff] }
 0x13f   :  { %v307_v29 = vadd.f32 %v305_v21, %v199_v17  ;;  %v319_v30 = vadd.f32 %v317_v22, %v213_v18  ;;  %v3507_v18 = vld [vmem:[#allocation8 + $0x4] ss:$0 sm:$0xff]  ;;  %v4672_v21 = vmov 30   ;;  %v726_v22 = vpop.permute.xlu0 %725 }
 0x140   :  { %v306_v34 = vadd.f32 %v304_v26, %v198_v23  ;;  %v318_v35 = vadd.f32 %v316_v28, %v212_v24 }
 0x141   :  { %v3815_v38 = vpop.f32.mrb[2].mxu0 }
 0x142   :  { %v403_v40 = vadd.f32 %v3815_v38, %v3501_v32  ;;  %v3826_v15 = vpop.f32.mrb[2].mxu1  ;;  %v397_v45 = vpop.f32.mrb[3].mxu0 }
 0x143   :  { %v507_v39 = vadd.f32 %v3826_v15, %v3504_v37  ;;  %v398_v46 = vadd.f32 %v3501_v32, %v397_v45  ;;  %v501_v48 = vpop.f32.mrb[3].mxu1  ;;  %v5053_v32 = vpop.permute.xlu1 %1873 }
 0x144   :  { %v407_v51 = vadd.f32 %v403_v40, %v303_v20  ;;  %v409_v53 = vmul.f32 %v403_v40, %v403_v40  ;;  %v421_v36 = vmul.f32 %v4982_v41, %v403_v40  ;;  %v502_v55 = vadd.f32 %v3504_v37, %v501_v48 }
 0x145   :  { %3225 = vperm.xlu1 %4481, %v5010_v52   ;;  %v513_v59 = vmul.f32 %v507_v39, %v507_v39  ;;  %v406_v60 = vadd.f32 %v398_v46, %v302_v25  ;;  %v408_v0 = vmul.f32 %v398_v46, %v398_v46  ;;  %v420_v1 = vmul.f32 %v414_v31, %v398_v46 }
 0x146   :  { %v411_v6 = vadd.f32 %v409_v53, %v307_v29  ;;  %v511_v10 = vadd.f32 %v507_v39, %v407_v51  ;;  %v512_v11 = vmul.f32 %v502_v55, %v502_v55  ;;  %v524_v12 = vmul.f32 %v4988_v42, %v502_v55 }
 0x147   :  { %v410_v13 = vadd.f32 %v408_v0, %v306_v34  ;;  %v422_v14 = vadd.f32 %v420_v1, %v318_v35  ;;  %v510_v27 = vadd.f32 %v502_v55, %v406_v60  ;;  %v423_v16 = vadd.f32 %v421_v36, %v319_v30  ;;  %v3513_v0 = vld [vmem:[#allocation8 + $0x6] ss:$0 sm:$0xff]  ;;  %v834_v1 = vpop.permute.xlu0 %833 }
 0x148   :  { %v515_v41 = vadd.f32 %v513_v59, %v411_v6  ;;  %v525_v17 = vmul.f32 %v522_v4, %v507_v39  ;;  %v3516_v6 = vld [vmem:[#allocation8 + $0x7] ss:$0 sm:$0xff] }
 0x149   :  { %v514_v20 = vadd.f32 %v512_v11, %v410_v13  ;;  %4482 = vset.pattern.permute.xlu1 %v4672_v21  ;;  %v526_v23 = vadd.f32 %v524_v12, %v422_v14 }
 0x14a   :  { %v527_v24 = vadd.f32 %v525_v17, %v423_v16  ;;  %3325 = vperm.xlu1 %4482, %v5003_v49   ;;  %v3837_v25 = vpop.f32.mrb[4].mxu0  ;;  %v3848_v26 = vpop.f32.mrb[4].mxu1 }
 0x14b   :  { %v611_v28 = vadd.f32 %v3837_v25, %v3507_v18  ;;  %v715_v42 = vadd.f32 %v3848_v26, %v3510_v19  ;;  %v605_v29 = vpop.f32.mrb[5].mxu0  ;;  %v709_v31 = vpop.f32.mrb[5].mxu1 }
 0x14c   :  { %v606_v30 = vadd.f32 %v3507_v18, %v605_v29  ;;  %v710_v34 = vadd.f32 %v3510_v19, %v709_v31 }
 0x14d   :  { %v615_v35 = vadd.f32 %v611_v28, %v511_v10  ;;  %v617_v37 = vmul.f32 %v611_v28, %v611_v28  ;;  %v629_v38 = vmul.f32 %v4996_v44, %v611_v28  ;;  %v721_v40 = vmul.f32 %v715_v42, %v715_v42  ;;  %v5059_v10 = vpop.permute.xlu1 %1977 }
 0x14e   :  { %3329 = vperm.xlu1 %4482, %v5010_v52   ;;  %v733_v15 = vmul.f32 %v5000_v47, %v715_v42  ;;  %v614_v45 = vadd.f32 %v606_v30, %v510_v27  ;;  %v616_v39 = vmul.f32 %v606_v30, %v606_v30  ;;  %v628_v46 = vmul.f32 %v4992_v43, %v606_v30 }
 0x14f   :  { %v619_v48 = vadd.f32 %v617_v37, %v515_v41  ;;  %v719_v51 = vadd.f32 %v715_v42, %v615_v35  ;;  %v720_v53 = vmul.f32 %v710_v34, %v710_v34  ;;  %v732_v36 = vmul.f32 %v726_v22, %v710_v34  ;;  %v3519_v35 = vld [vmem:[#allocation8 + $0x8] ss:$0 sm:$0xff] }
 0x150   :  { %v618_v55 = vadd.f32 %v616_v39, %v514_v20  ;;  %v718_v59 = vadd.f32 %v710_v34, %v614_v45  ;;  %v630_v60 = vadd.f32 %v628_v46, %v526_v23  ;;  %v631_v4 = vadd.f32 %v629_v38, %v527_v24 }
 0x151   :  { %v723_v44 = vadd.f32 %v721_v40, %v619_v48  ;;  %v5066_v29 = vpop.permute.xlu1 %2077 }
 0x152   :  { %v722_v11 = vadd.f32 %v720_v53, %v618_v55  ;;  %v734_v47 = vadd.f32 %v732_v36, %v630_v60  ;;  %4483 = vset.pattern.permute.xlu1 %v4671_v9  ;;  %v3859_v12 = vpop.f32.mrb[6].mxu0  ;;  %v735_v43 = vadd.f32 %v733_v15, %v631_v4  ;;  %v1038_v9 = vpop.permute.xlu0 %1037  ;;  %v3522_v15 = vld [vmem:[#allocation8 + $0x9] ss:$0 sm:$0xff] }
 0x153   :  { %3429 = vperm.xlu1 %4483, %v5003_v49   ;;  %v819_v13 = vadd.f32 %v3859_v12, %v3513_v0  ;;  %v3870_v14 = vpop.f32.mrb[6].mxu1  ;;  %v813_v27 = vpop.f32.mrb[7].mxu0 }
 0x154   :  { %v923_v16 = vadd.f32 %v3870_v14, %v3516_v6  ;;  %v814_v41 = vadd.f32 %v3513_v0, %v813_v27  ;;  %v917_v17 = vpop.f32.mrb[7].mxu1 }
 0x155   :  { %v823_v18 = vadd.f32 %v819_v13, %v719_v51  ;;  %v825_v19 = vmul.f32 %v819_v13, %v819_v13  ;;  %v837_v20 = vmul.f32 %v834_v1, %v819_v13  ;;  %v918_v21 = vadd.f32 %v3516_v6, %v917_v17  ;;  %v5070_v4 = vpop.permute.xlu1 %2181  ;;  %v3525_v17 = vld [vmem:[#allocation8 + $0xa] ss:$0 sm:$0xff] }
 0x156   :  { %v929_v22 = vmul.f32 %v923_v16, %v923_v16  ;;  %v941_v23 = vmul.f32 %v5015_v54, %v923_v16  ;;  %v822_v24 = vadd.f32 %v814_v41, %v718_v59  ;;  %v824_v25 = vmul.f32 %v814_v41, %v814_v41  ;;  %v1146_v55 = vpop.permute.xlu0 %1145 }
 0x157   :  { %v827_v26 = vadd.f32 %v825_v19, %v723_v44  ;;  %v927_v28 = vadd.f32 %v923_v16, %v823_v18  ;;  %v839_v42 = vadd.f32 %v837_v20, %v735_v43  ;;  %3433 = vperm.xlu1 %4483, %v5010_v52   ;;  %v836_v49 = vmul.f32 %v5007_v50, %v814_v41 }
 0x158   :  { %v826_v31 = vadd.f32 %v824_v25, %v722_v11  ;;  %v926_v30 = vadd.f32 %v918_v21, %v822_v24  ;;  %v928_v34 = vmul.f32 %v918_v21, %v918_v21  ;;  %v940_v54 = vmul.f32 %v5013_v2, %v918_v21 }
 0x159   :  { %v931_v37 = vadd.f32 %v929_v22, %v827_v26  ;;  %v943_v38 = vadd.f32 %v941_v23, %v839_v42  ;;  %v838_v40 = vadd.f32 %v836_v49, %v734_v47 }
 0x15a   :  { %v930_v45 = vadd.f32 %v928_v34, %v826_v31  ;;  %v3881_v39 = vpop.f32.mrb[8].mxu0  ;;  %v1350_v22 = vpop.permute.xlu0 %1349 }
 0x15b   :  { %v942_v46 = vadd.f32 %v940_v54, %v838_v40  ;;  %v1027_v48 = vadd.f32 %v3881_v39, %v3519_v35  ;;  %v3892_v51 = vpop.f32.mrb[8].mxu1  ;;  %v1021_v52 = vpop.f32.mrb[9].mxu0 }
 0x15c   :  { %v1131_v53 = vadd.f32 %v3892_v51, %v3522_v15  ;;  %v1022_v50 = vadd.f32 %v3519_v35, %v1021_v52  ;;  %v1125_v36 = vpop.f32.mrb[9].mxu1 }
 0x15d   :  { %v1031_v59 = vadd.f32 %v1027_v48, %v927_v28  ;;  %v1033_v60 = vmul.f32 %v1027_v48, %v1027_v48  ;;  %v1045_v0 = vmul.f32 %v5018_v56, %v1027_v48  ;;  %v1126_v1 = vadd.f32 %v3522_v15, %v1125_v36  ;;  %v3528_v56 = vld [vmem:[#allocation8 + $0xb] ss:$0 sm:$0xff]  ;;  %v5073_v28 = vpop.permute.xlu1 %2185 }
 0x15e   :  { %v1137_v44 = vmul.f32 %v1131_v53, %v1131_v53  ;;  %v1030_v2 = vadd.f32 %v1022_v50, %v926_v30  ;;  %v1032_v6 = vmul.f32 %v1022_v50, %v1022_v50  ;;  %v1044_v11 = vmul.f32 %v1038_v9, %v1022_v50 }
 0x15f   :  { %v1035_v47 = vadd.f32 %v1033_v60, %v931_v37  ;;  %v1135_v12 = vadd.f32 %v1131_v53, %v1031_v59  ;;  %v1136_v43 = vmul.f32 %v1126_v1, %v1126_v1  ;;  %v1148_v13 = vmul.f32 %v5022_v8, %v1126_v1  ;;  %v1458_v59 = vpop.permute.xlu0 %1457  ;;  %v3534_v60 = vld [vmem:[#allocation8 + $0xd] ss:$0 sm:$0xff] }
 0x160   :  { %v1034_v14 = vadd.f32 %v1032_v6, %v930_v45  ;;  %v1046_v27 = vadd.f32 %v1044_v11, %v942_v46  ;;  %v1134_v16 = vadd.f32 %v1126_v1, %v1030_v2  ;;  %v1047_v41 = vadd.f32 %v1045_v0, %v943_v38 }
 0x161   :  { %v1139_v18 = vadd.f32 %v1137_v44, %v1035_v47  ;;  %v1149_v19 = vmul.f32 %v1146_v55, %v1131_v53  ;;  %v5078_v0 = vpop.permute.xlu1 %2289 }
 0x162   :  { %v1138_v20 = vadd.f32 %v1136_v43, %v1034_v14  ;;  %v1150_v21 = vadd.f32 %v1148_v13, %v1046_v27  ;;  %v3903_v23 = vpop.f32.mrb[10].mxu0 }
 0x163   :  { %v1151_v24 = vadd.f32 %v1149_v19, %v1047_v41  ;;  %v1235_v25 = vadd.f32 %v3903_v23, %v3525_v17  ;;  %v3914_v9 = vpop.f32.mrb[10].mxu1  ;;  %v1229_v26 = vpop.f32.mrb[11].mxu0 }
 0x164   :  { %v1339_v42 = vadd.f32 %v3914_v9, %v3528_v56  ;;  %v1230_v8 = vadd.f32 %v3525_v17, %v1229_v26  ;;  %v1333_v49 = vpop.f32.mrb[11].mxu1 }
 0x165   :  { %v1239_v31 = vadd.f32 %v1235_v25, %v1135_v12  ;;  %v1241_v30 = vmul.f32 %v1235_v25, %v1235_v25  ;;  %v1253_v34 = vmul.f32 %v5026_v58, %v1235_v25  ;;  %v1334_v35 = vadd.f32 %v3528_v56, %v1333_v49  ;;  %v3531_v58 = vld [vmem:[#allocation8 + $0xc] ss:$0 sm:$0xff]  ;;  %v1662_v56 = vpop.permute.xlu0 %1661 }
 0x166   :  { %v1345_v37 = vmul.f32 %v1339_v42, %v1339_v42  ;;  %v1357_v38 = vmul.f32 %v5029_v61, %v1339_v42  ;;  %v1238_v40 = vadd.f32 %v1230_v8, %v1134_v16  ;;  %v1240_v54 = vmul.f32 %v1230_v8, %v1230_v8 }
 0x167   :  { %v1243_v15 = vadd.f32 %v1241_v30, %v1139_v18  ;;  %v1255_v45 = vadd.f32 %v1253_v34, %v1151_v24  ;;  %v1343_v39 = vadd.f32 %v1339_v42, %v1239_v31  ;;  %v1252_v46 = vmul.f32 %v5024_v57, %v1230_v8  ;;  %v3537_v8 = vld [vmem:[#allocation8 + $0xe] ss:$0 sm:$0xff] }
 0x168   :  { %v1242_v48 = vadd.f32 %v1240_v54, %v1138_v20  ;;  %v1342_v51 = vadd.f32 %v1334_v35, %v1238_v40  ;;  %v1344_v52 = vmul.f32 %v1334_v35, %v1334_v35  ;;  %v1356_v55 = vmul.f32 %v1350_v22, %v1334_v35  ;;  %v5082_v20 = vpop.permute.xlu1 %2389 }
 0x169   :  { %v1347_v53 = vadd.f32 %v1345_v37, %v1243_v15  ;;  %v1359_v50 = vadd.f32 %v1357_v38, %v1255_v45  ;;  %v1254_v36 = vadd.f32 %v1252_v46, %v1150_v21  ;;  %v1770_v40 = vpop.permute.xlu0 %1769 }
 0x16a   :  { %v1346_v61 = vadd.f32 %v1344_v52, %v1242_v48 }
 0x16b   :  { %v1358_v1 = vadd.f32 %v1356_v55, %v1254_v36  ;;  %v3925_v44 = vpop.f32.mrb[12].mxu0  ;;  %v3936_v2 = vpop.f32.mrb[12].mxu1 }
 0x16c   :  { %v1443_v6 = vadd.f32 %v3925_v44, %v3531_v58  ;;  %v1547_v11 = vadd.f32 %v3936_v2, %v3534_v60  ;;  %v1437_v47 = vpop.f32.mrb[13].mxu0  ;;  %v1541_v57 = vpop.f32.mrb[13].mxu1  ;;  %v3543_v2 = vld [vmem:[#allocation8 + $0x10] ss:$0 sm:$0xff] }
 0x16d   :  { %v1438_v12 = vadd.f32 %v3531_v58, %v1437_v47  ;;  %v1542_v43 = vadd.f32 %v3534_v60, %v1541_v57 }
 0x16e   :  { %v1447_v13 = vadd.f32 %v1443_v6, %v1343_v39  ;;  %v1449_v14 = vmul.f32 %v1443_v6, %v1443_v6  ;;  %v1461_v27 = vmul.f32 %v1458_v59, %v1443_v6  ;;  %v1553_v16 = vmul.f32 %v1547_v11, %v1547_v11  ;;  %v5085_v39 = vpop.permute.xlu1 %2493 }
 0x16f   :  { %v1565_v41 = vmul.f32 %v5037_v3, %v1547_v11  ;;  %v1446_v17 = vadd.f32 %v1438_v12, %v1342_v51  ;;  %v1448_v18 = vmul.f32 %v1438_v12, %v1438_v12  ;;  %v1460_v19 = vmul.f32 %v5031_v62, %v1438_v12  ;;  %v3540_v3 = vld [vmem:[#allocation8 + $0xf] ss:$0 sm:$0xff]  ;;  %v3546_v12 = vld [vmem:[#allocation8 + $0x11] ss:$0 sm:$0xff] }
 0x170   :  { %v1451_v21 = vadd.f32 %v1449_v14, %v1347_v53  ;;  %v1463_v22 = vadd.f32 %v1461_v27, %v1359_v50  ;;  %v1551_v23 = vadd.f32 %v1547_v11, %v1447_v13  ;;  %v1552_v24 = vmul.f32 %v1542_v43, %v1542_v43 }
 0x171   :  { %v1450_v25 = vadd.f32 %v1448_v18, %v1346_v61  ;;  %v1462_v9 = vadd.f32 %v1460_v19, %v1358_v1  ;;  %v1550_v26 = vadd.f32 %v1542_v43, %v1446_v17  ;;  %v1564_v42 = vmul.f32 %v5033_v63, %v1542_v43  ;;  %v1974_v43 = vpop.permute.xlu0 %1973 }
 0x172   :  { %v1555_v49 = vadd.f32 %v1553_v16, %v1451_v21  ;;  %v1567_v31 = vadd.f32 %v1565_v41, %v1463_v22  ;;  %v5089_v14 = vpop.permute.xlu1 %2497 }
 0x173   :  { %v1554_v30 = vadd.f32 %v1552_v24, %v1450_v25  ;;  %v1566_v34 = vadd.f32 %v1564_v42, %v1462_v9  ;;  %v3947_v35 = vpop.f32.mrb[14].mxu0 }
 0x174   :  { %v1651_v62 = vadd.f32 %v3947_v35, %v3537_v8  ;;  %v3958_v37 = vpop.f32.mrb[14].mxu1  ;;  %v1645_v38 = vpop.f32.mrb[15].mxu0 }
 0x175   :  { %v1755_v54 = vadd.f32 %v3958_v37, %v3540_v3  ;;  %v1646_v15 = vadd.f32 %v3537_v8, %v1645_v38  ;;  %v1749_v45 = vpop.f32.mrb[15].mxu1  ;;  %v2082_v35 = vpop.permute.xlu0 %2081  ;;  %v3549_v37 = vld [vmem:[#allocation8 + $0x12] ss:$0 sm:$0xff]  ;;  %v3552_v38 = vld [vmem:[#allocation8 + $0x13] ss:$0 sm:$0xff] }
 0x176   :  { %v1655_v46 = vadd.f32 %v1651_v62, %v1551_v23  ;;  %v1657_v48 = vmul.f32 %v1651_v62, %v1651_v62  ;;  %v1669_v63 = vmul.f32 %v5041_v7, %v1651_v62  ;;  %v1750_v51 = vadd.f32 %v3540_v3, %v1749_v45 }
 0x177   :  { %v1761_v52 = vmul.f32 %v1755_v54, %v1755_v54  ;;  %v1773_v53 = vmul.f32 %v1770_v40, %v1755_v54  ;;  %v1654_v50 = vadd.f32 %v1646_v15, %v1550_v26  ;;  %v1656_v36 = vmul.f32 %v1646_v15, %v1646_v15 }
 0x178   :  { %v1659_v55 = vadd.f32 %v1657_v48, %v1555_v49  ;;  %v1671_v59 = vadd.f32 %v1669_v63, %v1567_v31  ;;  %v1759_v58 = vadd.f32 %v1755_v54, %v1655_v46  ;;  %v1668_v60 = vmul.f32 %v1662_v56, %v1646_v15 }
 0x179   :  { %v1658_v61 = vadd.f32 %v1656_v36, %v1554_v30  ;;  %v1758_v1 = vadd.f32 %v1750_v51, %v1654_v50  ;;  %v1760_v44 = vmul.f32 %v1750_v51, %v1750_v51  ;;  %v1772_v57 = vmul.f32 %v5045_v33, %v1750_v51 }
 0x17a   :  { %v1763_v6 = vadd.f32 %v1761_v52, %v1659_v55  ;;  %v1775_v11 = vadd.f32 %v1773_v53, %v1671_v59  ;;  %v1670_v47 = vadd.f32 %v1668_v60, %v1566_v34  ;;  %v2286_v60 = vpop.permute.xlu0 %2285 }
 0x17b   :  { %v1762_v7 = vadd.f32 %v1760_v44, %v1658_v61  ;;  %v3969_v13 = vpop.f32.mrb[16].mxu0 }
 0x17c   :  { %v1774_v27 = vadd.f32 %v1772_v57, %v1670_v47  ;;  %v1859_v16 = vadd.f32 %v3969_v13, %v3543_v2  ;;  %v3980_v41 = vpop.f32.mrb[16].mxu1  ;;  %v1853_v18 = vpop.f32.mrb[17].mxu0 }
 0x17d   :  { %v1963_v17 = vadd.f32 %v3980_v41, %v3546_v12  ;;  %v1957_v19 = vpop.f32.mrb[17].mxu1  ;;  %v1854_v23 = vadd.f32 %v3543_v2, %v1853_v18  ;;  %v3558_v18 = vld [vmem:[#allocation8 + $0x15] ss:$0 sm:$0xff] }
 0x17e   :  { %v1863_v56 = vadd.f32 %v1859_v16, %v1759_v58  ;;  %v1865_v21 = vmul.f32 %v1859_v16, %v1859_v16  ;;  %v1877_v22 = vmul.f32 %v5053_v32, %v1859_v16  ;;  %v1958_v25 = vadd.f32 %v3546_v12, %v1957_v19  ;;  %v5094_v32 = vpop.permute.xlu1 %2601  ;;  %v3555_v16 = vld [vmem:[#allocation8 + $0x14] ss:$0 sm:$0xff] }
 0x17f   :  { %v1969_v24 = vmul.f32 %v1963_v17, %v1963_v17  ;;  %v1981_v33 = vmul.f32 %v5059_v10, %v1963_v17  ;;  %v1862_v8 = vadd.f32 %v1854_v23, %v1758_v1  ;;  %v1864_v49 = vmul.f32 %v1854_v23, %v1854_v23 }
 0x180   :  { %v1867_v9 = vadd.f32 %v1865_v21, %v1763_v6  ;;  %v1879_v26 = vadd.f32 %v1877_v22, %v1775_v11  ;;  %v1967_v42 = vadd.f32 %v1963_v17, %v1863_v56  ;;  %v1876_v31 = vmul.f32 %v5049_v5, %v1854_v23  ;;  %v2394_v23 = vpop.permute.xlu0 %2393 }
 0x181   :  { %v1968_v3 = vmul.f32 %v1958_v25, %v1958_v25  ;;  %v1966_v62 = vadd.f32 %v1958_v25, %v1862_v8  ;;  %v1866_v40 = vadd.f32 %v1864_v49, %v1762_v7  ;;  %v1980_v10 = vmul.f32 %v1974_v43, %v1958_v25 }
 0x182   :  { %v1971_v30 = vadd.f32 %v1969_v24, %v1867_v9  ;;  %v1983_v34 = vadd.f32 %v1981_v33, %v1879_v26  ;;  %v1878_v54 = vadd.f32 %v1876_v31, %v1774_v27  ;;  %v5098_v12 = vpop.permute.xlu1 %2701 }
 0x183   :  { %v1970_v46 = vadd.f32 %v1968_v3, %v1866_v40 }
 0x184   :  { %v3991_v15 = vpop.f32.mrb[18].mxu0  ;;  %v4002_v45 = vpop.f32.mrb[18].mxu1  ;;  %v1982_v48 = vadd.f32 %v1980_v10, %v1878_v54  ;;  %v3561_v10 = vld [vmem:[#allocation8 + $0x16] ss:$0 sm:$0xff] }
 0x185   :  { %v2067_v63 = vadd.f32 %v3991_v15, %v3549_v37  ;;  %v2171_v51 = vadd.f32 %v4002_v45, %v3552_v38  ;;  %v2061_v52 = vpop.f32.mrb[19].mxu0  ;;  %v2165_v5 = vpop.f32.mrb[19].mxu1 }
 0x186   :  { %v2062_v53 = vadd.f32 %v3549_v37, %v2061_v52  ;;  %v2166_v50 = vadd.f32 %v3552_v38, %v2165_v5 }
 0x187   :  { %v2071_v36 = vadd.f32 %v2067_v63, %v1967_v42  ;;  %v2073_v55 = vmul.f32 %v2067_v63, %v2067_v63  ;;  %v2085_v59 = vmul.f32 %v2082_v35, %v2067_v63  ;;  %v2177_v58 = vmul.f32 %v2171_v51, %v2171_v51  ;;  %v2598_v63 = vpop.permute.xlu0 %2597 }
 0x188   :  { %v2189_v61 = vmul.f32 %v5073_v28, %v2171_v51  ;;  %v2070_v1 = vadd.f32 %v2062_v53, %v1966_v62  ;;  %v2072_v44 = vmul.f32 %v2062_v53, %v2062_v53  ;;  %v2084_v2 = vmul.f32 %v5066_v29, %v2062_v53 }
 0x189   :  { %v2075_v6 = vadd.f32 %v2073_v55, %v1971_v30  ;;  %v2087_v11 = vadd.f32 %v2085_v59, %v1983_v34  ;;  %v2175_v47 = vadd.f32 %v2171_v51, %v2071_v36  ;;  %v2176_v57 = vmul.f32 %v2166_v50, %v2166_v50 }
 0x18a   :  { %v2074_v7 = vadd.f32 %v2072_v44, %v1970_v46  ;;  %v2086_v43 = vadd.f32 %v2084_v2, %v1982_v48  ;;  %v2174_v13 = vadd.f32 %v2166_v50, %v2070_v1  ;;  %v2188_v27 = vmul.f32 %v5070_v4, %v2166_v50  ;;  %v5102_v4 = vpop.permute.xlu1 %2805  ;;  %v3564_v48 = vld [vmem:[#allocation8 + $0x17] ss:$0 sm:$0xff] }
 0x18b   :  { %v2179_v41 = vadd.f32 %v2177_v58, %v2075_v6  ;;  %v2191_v17 = vadd.f32 %v2189_v61, %v2087_v11 }
 0x18c   :  { %v2178_v28 = vadd.f32 %v2176_v57, %v2074_v7  ;;  %v2190_v19 = vadd.f32 %v2188_v27, %v2086_v43  ;;  %v4013_v56 = vpop.f32.mrb[20].mxu0 }
 0x18d   :  { %v2275_v21 = vadd.f32 %v4013_v56, %v3555_v16  ;;  %v4024_v29 = vpop.f32.mrb[20].mxu1  ;;  %v2269_v22 = vpop.f32.mrb[21].mxu0  ;;  %v3567_v56 = vld [vmem:[#allocation8 + $0x18] ss:$0 sm:$0xff] }
 0x18e   :  { %v2379_v24 = vadd.f32 %v4024_v29, %v3558_v18  ;;  %v2270_v33 = vadd.f32 %v3555_v16, %v2269_v22  ;;  %v2373_v25 = vpop.f32.mrb[21].mxu1  ;;  %v2810_v55 = vpop.permute.xlu1 %2809 }
 0x18f   :  { %v2279_v9 = vadd.f32 %v2275_v21, %v2175_v47  ;;  %v2281_v26 = vmul.f32 %v2275_v21, %v2275_v21  ;;  %v2293_v42 = vmul.f32 %v5078_v0, %v2275_v21  ;;  %v2374_v8 = vadd.f32 %v3558_v18, %v2373_v25  ;;  %v2706_v29 = vpop.permute.xlu0 %2705 }
 0x190   :  { %v2385_v49 = vmul.f32 %v2379_v24, %v2379_v24  ;;  %v2397_v31 = vmul.f32 %v2394_v23, %v2379_v24  ;;  %v2278_v3 = vadd.f32 %v2270_v33, %v2174_v13  ;;  %v2280_v30 = vmul.f32 %v2270_v33, %v2270_v33 }
 0x191   :  { %v2283_v34 = vadd.f32 %v2281_v26, %v2179_v41  ;;  %v2295_v35 = vadd.f32 %v2293_v42, %v2191_v17  ;;  %v2383_v62 = vadd.f32 %v2379_v24, %v2279_v9  ;;  %v2292_v37 = vmul.f32 %v2286_v60, %v2270_v33 }
 0x192   :  { %v2282_v38 = vadd.f32 %v2280_v30, %v2178_v28  ;;  %v2382_v40 = vadd.f32 %v2374_v8, %v2278_v3  ;;  %v2384_v54 = vmul.f32 %v2374_v8, %v2374_v8  ;;  %v2396_v0 = vmul.f32 %v5082_v20, %v2374_v8  ;;  %v2914_v21 = vpop.permute.xlu1 %2913 }
 0x193   :  { %v2387_v15 = vadd.f32 %v2385_v49, %v2283_v34  ;;  %v2399_v45 = vadd.f32 %v2397_v31, %v2295_v35  ;;  %v2294_v46 = vadd.f32 %v2292_v37, %v2190_v19  ;;  %v2910_v37 = vpop.permute.xlu0 %2909 }
 0x194   :  { %v2386_v51 = vadd.f32 %v2384_v54, %v2282_v38  ;;  %v4035_v52 = vpop.f32.mrb[22].mxu0 }
 0x195   :  { %v2398_v5 = vadd.f32 %v2396_v0, %v2294_v46  ;;  %v2483_v53 = vadd.f32 %v4035_v52, %v3561_v10  ;;  %v4046_v50 = vpop.f32.mrb[22].mxu1  ;;  %v2477_v36 = vpop.f32.mrb[23].mxu0 }
 0x196   :  { %v2587_v59 = vadd.f32 %v4046_v50, %v3564_v48  ;;  %v2478_v58 = vadd.f32 %v3561_v10, %v2477_v36  ;;  %v2581_v60 = vpop.f32.mrb[23].mxu1 }
 0x197   :  { %v2487_v61 = vadd.f32 %v2483_v53, %v2383_v62  ;;  %v2489_v1 = vmul.f32 %v2483_v53, %v2483_v53  ;;  %v2501_v44 = vmul.f32 %v5089_v14, %v2483_v53  ;;  %v2582_v2 = vadd.f32 %v3564_v48, %v2581_v60  ;;  %v3570_v14 = vld [vmem:[#allocation8 + $0x19] ss:$0 sm:$0xff] }
 0x198   :  { %v2593_v6 = vmul.f32 %v2587_v59, %v2587_v59  ;;  %v2605_v20 = vmul.f32 %v5094_v32, %v2587_v59  ;;  %v2486_v11 = vadd.f32 %v2478_v58, %v2382_v40  ;;  %v2488_v47 = vmul.f32 %v2478_v58, %v2478_v58 }
 0x199   :  { %v2491_v57 = vadd.f32 %v2489_v1, %v2387_v15  ;;  %v2503_v7 = vadd.f32 %v2501_v44, %v2399_v45  ;;  %v2591_v43 = vadd.f32 %v2587_v59, %v2487_v61  ;;  %v2500_v13 = vmul.f32 %v5085_v39, %v2478_v58  ;;  %v3014_v15 = vpop.permute.xlu1 %3013  ;;  %v3018_v1 = vpop.permute.xlu0 %3017 }
 0x19a   :  { %v2490_v27 = vadd.f32 %v2488_v47, %v2386_v51  ;;  %v2590_v16 = vadd.f32 %v2582_v2, %v2486_v11  ;;  %v2592_v41 = vmul.f32 %v2582_v2, %v2582_v2  ;;  %v2604_v19 = vmul.f32 %v2598_v63, %v2582_v2  ;;  %v3573_v63 = vld [vmem:[#allocation8 + $0x1a] ss:$0 sm:$0xff] }
 0x19b   :  { %v2595_v17 = vadd.f32 %v2593_v6, %v2491_v57  ;;  %v2607_v18 = vadd.f32 %v2605_v20, %v2503_v7  ;;  %v2502_v28 = vadd.f32 %v2500_v13, %v2398_v5  ;;  %v3576_v5 = vld [vmem:[#allocation8 + $0x1b] ss:$0 sm:$0xff] }
 0x19c   :  { %v2594_v22 = vadd.f32 %v2592_v41, %v2490_v27 }
 0x19d   :  { %v2606_v32 = vadd.f32 %v2604_v19, %v2502_v28  ;;  %v4057_v23 = vpop.f32.mrb[24].mxu0  ;;  %v4068_v24 = vpop.f32.mrb[24].mxu1  ;;  %v3579_v28 = vld [vmem:[#allocation8 + $0x1c] ss:$0 sm:$0xff] }
 0x19e   :  { %v2691_v33 = vadd.f32 %v4057_v23, %v3567_v56  ;;  %v2795_v25 = vadd.f32 %v4068_v24, %v3570_v14  ;;  %v2685_v9 = vpop.f32.mrb[25].mxu0  ;;  %v2789_v26 = vpop.f32.mrb[25].mxu1 }
 0x19f   :  { %v2686_v39 = vadd.f32 %v3567_v56, %v2685_v9  ;;  %v2790_v42 = vadd.f32 %v3570_v14, %v2789_v26  ;;  %v3118_v11 = vpop.permute.xlu1 %3117 }
 0x1a0   :  { %v2695_v8 = vadd.f32 %v2691_v33, %v2591_v43  ;;  %v2697_v49 = vmul.f32 %v2691_v33, %v2691_v33  ;;  %v2709_v31 = vmul.f32 %v2706_v29, %v2691_v33  ;;  %v2801_v3 = vmul.f32 %v2795_v25, %v2795_v25  ;;  %v3582_v33 = vld [vmem:[#allocation8 + $0x1d] ss:$0 sm:$0xff] }
 0x1a1   :  { %v2813_v30 = vmul.f32 %v2810_v55, %v2795_v25  ;;  %v2694_v34 = vadd.f32 %v2686_v39, %v2590_v16  ;;  %v2696_v35 = vmul.f32 %v2686_v39, %v2686_v39  ;;  %v2708_v62 = vmul.f32 %v5098_v12, %v2686_v39 }
 0x1a2   :  { %v2699_v38 = vadd.f32 %v2697_v49, %v2595_v17  ;;  %v2711_v40 = vadd.f32 %v2709_v31, %v2607_v18  ;;  %v2799_v54 = vadd.f32 %v2795_v25, %v2695_v8  ;;  %v2800_v10 = vmul.f32 %v2790_v42, %v2790_v42 }
 0x1a3   :  { %v2698_v45 = vadd.f32 %v2696_v35, %v2594_v22  ;;  %v2710_v46 = vadd.f32 %v2708_v62, %v2606_v32  ;;  %v2798_v0 = vadd.f32 %v2790_v42, %v2694_v34  ;;  %v2812_v48 = vmul.f32 %v5102_v4, %v2790_v42  ;;  %v3122_v9 = vpop.permute.xlu1 %3121 }
 0x1a4   :  { %v2803_v51 = vadd.f32 %v2801_v3, %v2699_v38  ;;  %v2815_v52 = vadd.f32 %v2813_v30, %v2711_v40 }
 0x1a5   :  { %v2802_v53 = vadd.f32 %v2800_v10, %v2698_v45  ;;  %v2814_v50 = vadd.f32 %v2812_v48, %v2710_v46  ;;  %v4079_v36 = vpop.f32.mrb[26].mxu0 }
 0x1a6   :  { %v2899_v55 = vadd.f32 %v4079_v36, %v3573_v63  ;;  %v4090_v12 = vpop.f32.mrb[26].mxu1  ;;  %v2893_v59 = vpop.f32.mrb[27].mxu0 }
 0x1a7   :  { %v3003_v58 = vadd.f32 %v4090_v12, %v3576_v5  ;;  %v2894_v60 = vadd.f32 %v3573_v63, %v2893_v59  ;;  %v2997_v61 = vpop.f32.mrb[27].mxu1  ;;  %v3585_v63 = vld [vmem:[#allocation8 + $0x1e] ss:$0 sm:$0xff] }
 0x1a8   :  { %v2903_v44 = vadd.f32 %v2899_v55, %v2799_v54  ;;  %v2905_v2 = vmul.f32 %v2899_v55, %v2899_v55  ;;  %v2917_v6 = vmul.f32 %v2914_v21, %v2899_v55  ;;  %v2998_v20 = vadd.f32 %v3576_v5, %v2997_v61 }
 0x1a9   :  { %v3009_v4 = vmul.f32 %v3003_v58, %v3003_v58  ;;  %v3021_v47 = vmul.f32 %v3018_v1, %v3003_v58  ;;  %v2902_v57 = vadd.f32 %v2894_v60, %v2798_v0  ;;  %v2904_v7 = vmul.f32 %v2894_v60, %v2894_v60 }
 0x1aa   :  { %v2907_v43 = vadd.f32 %v2905_v2, %v2803_v51  ;;  %v2919_v13 = vadd.f32 %v2917_v6, %v2815_v52  ;;  %v3007_v27 = vadd.f32 %v3003_v58, %v2903_v44  ;;  %v2916_v16 = vmul.f32 %v2910_v37, %v2894_v60 }
 0x1ab   :  { %v2906_v41 = vadd.f32 %v2904_v7, %v2802_v53  ;;  %v3006_v17 = vadd.f32 %v2998_v20, %v2902_v57  ;;  %v3008_v18 = vmul.f32 %v2998_v20, %v2998_v20  ;;  %v3020_v14 = vmul.f32 %v3014_v15, %v2998_v20  ;;  %v5110_v32 = vpop.xlane.xlu0 %3455 }
 0x1ac   :  { %v3011_v19 = vadd.f32 %v3009_v4, %v2907_v43  ;;  %v2918_v56 = vadd.f32 %v2916_v16, %v2814_v50  ;;  %v3023_v29 = vadd.f32 %v3021_v47, %v2919_v13  ;;  %v3588_v50 = vld [vmem:[#allocation8 + $0x1f] ss:$0 sm:$0xff] }
 0x1ad   :  { %v3010_v22 = vadd.f32 %v3008_v18, %v2906_v41  ;;  %v4101_v21 = vpop.f32.mrb[28].mxu0 }
 0x1ae   :  { %v3107_v23 = vadd.f32 %v4101_v21, %v3579_v28  ;;  %v3101_v24 = vpop.f32.mrb[29].mxu0  ;;  %v3022_v25 = vadd.f32 %v3020_v14, %v2918_v56 }
 0x1af   :  { %v3102_v26 = vadd.f32 %v3579_v28, %v3101_v24 }
 0x1b0   :  { %v3111_v39 = vadd.f32 %v3107_v23, %v3007_v27  ;;  %v3113_v42 = vmul.f32 %v3107_v23, %v3107_v23  ;;  %v3125_v8 = vmul.f32 %v3122_v9, %v3107_v23  ;;  %v4112_v49 = vpop.f32.mrb[28].mxu1 }
 0x1b1   :  { %v3110_v31 = vadd.f32 %v3102_v26, %v3006_v17  ;;  %v3112_v3 = vmul.f32 %v3102_v26, %v3102_v26  ;;  %v3124_v30 = vmul.f32 %v3118_v11, %v3102_v26  ;;  %v3211_v34 = vadd.f32 %v4112_v49, %v3582_v33  ;;  %v3205_v35 = vpop.f32.mrb[29].mxu1 }
 0x1b2   :  { %v3115_v62 = vadd.f32 %v3113_v42, %v3011_v19  ;;  %v3206_v37 = vadd.f32 %v3582_v33, %v3205_v35  ;;  %v3127_v38 = vadd.f32 %v3125_v8, %v3023_v29 }
 0x1b3   :  { %v3114_v40 = vadd.f32 %v3112_v3, %v3010_v22  ;;  %v3215_v54 = vadd.f32 %v3211_v34, %v3111_v39  ;;  %v3217_v10 = vmul.f32 %v3211_v34, %v3211_v34  ;;  %v3222_v15 = vpop.permute.xlu0 %3221  ;;  %v3126_v45 = vadd.f32 %v3124_v30, %v3022_v25 }
 0x1b4   :  { %v3214_v46 = vadd.f32 %v3206_v37, %v3110_v31  ;;  %v3216_v0 = vmul.f32 %v3206_v37, %v3206_v37  ;;  %v3228_v48 = vmul.f32 %v3222_v15, %v3206_v37 }
 0x1b5   :  { %v3219_v51 = vadd.f32 %v3217_v10, %v3115_v62 }
 0x1b6   :  { %v3218_v52 = vadd.f32 %v3216_v0, %v3114_v40  ;;  %v3230_v5 = vadd.f32 %v3228_v48, %v3126_v45  ;;  %v4123_v53 = vpop.f32.mrb[30].mxu0  ;;  %v3470_v40 = vld [vmem:[#allocation10] sm:$0xff]  ;;  %v3471_v48 = vld [vmem:[#allocation10 + $0x8] sm:$0xff] }
 0x1b7   :  { %v3315_v36 = vadd.f32 %v4123_v53, %v3585_v63  ;;  %v3309_v55 = vpop.f32.mrb[31].mxu0 }
 0x1b8   :  { %v3310_v12 = vadd.f32 %v3585_v63, %v3309_v55  ;;  %v4134_v59 = vpop.f32.mrb[30].mxu1 }
 0x1b9   :  { %v3321_v58 = vmul.f32 %v3315_v36, %v3315_v36  ;;  %v3419_v60 = vadd.f32 %v4134_v59, %v3588_v50  ;;  %v3413_v61 = vpop.f32.mrb[31].mxu1  ;;  %v3319_v1 = vadd.f32 %v3315_v36, %v3215_v54 }
 0x1ba   :  { %v3318_v44 = vadd.f32 %v3310_v12, %v3214_v46  ;;  %v3320_v2 = vmul.f32 %v3310_v12, %v3310_v12  ;;  %v3414_v6 = vadd.f32 %v3588_v50, %v3413_v61 }
 0x1bb   :  { %v3323_v20 = vadd.f32 %v3321_v58, %v3219_v51  ;;  %v3425_v11 = vmul.f32 %v3419_v60, %v3419_v60  ;;  %v3423_v4 = vadd.f32 %v3419_v60, %v3319_v1 }
 0x1bc   :  { %v3322_v47 = vadd.f32 %v3320_v2, %v3218_v52  ;;  %v3422_v57 = vadd.f32 %v3414_v6, %v3318_v44  ;;  %v3424_v7 = vmul.f32 %v3414_v6, %v3414_v6 }
 0x1bd   :  { %v3427_v43 = vadd.f32 %v3425_v11, %v3323_v20  ;;  %v3445_v13 = vmul.f32 0.03125, %v3423_v4 }
 0x1be   :  { %v3426_v27 = vadd.f32 %v3424_v7, %v3322_v47  ;;  %v3444_v16 = vmul.f32 0.03125, %v3422_v57 }
 0x1bf   :  { %v3447_v41 = vmul.f32 0.03125, %v3427_v43  ;;  %v3449_v17 = vmul.f32 %v3445_v13, %v3445_v13 }
 0x1c0   :  { %v3446_v18 = vmul.f32 0.03125, %v3426_v27  ;;  %v3448_v28 = vmul.f32 %v3444_v16, %v3444_v16  ;;  %v3460_v35 = vmul.f32 %v5110_v32, %v3444_v16 }
 0x1c1   :  { %v3459_v19 = vpop.xlane.xlu1 %3458  ;;  %v3451_v56 = vsub.f32 %v3447_v41, %v3449_v17 }
 0x1c2   :  { %v3450_v14 = vsub.f32 %v3446_v18, %v3448_v28  ;;  %v3461_v54 = vmul.f32 %v3459_v19, %v3445_v13 }
 0x1c3   :  { %v3453_v25 = vmax.f32 %v3451_v56, 0.0 }
 0x1c4   :  { %v3452_v22 = vmax.f32 %v3450_v14, 0.0 }
 0x1c5   :  { %v3226_v29 = vpop.permute.xlu1 %3225  ;;  %v3465_v42 = vadd.f32 1e-05, %v3453_v25 }
 0x1c6   :  { %v3229_v21 = vmul.f32 %v3226_v29, %v3211_v34  ;;  %v3464_v33 = vadd.f32 1e-05, %v3452_v22 }
 0x1c8   :  { %v3231_v23 = vadd.f32 %v3229_v21, %v3127_v38  ;;  %4485 = vrsqrt.f32 %v3464_v33 }
 0x1c9   :  { %v3326_v24 = vpop.permute.xlu1 %3325  ;;  %4487 = vrsqrt.f32 %v3465_v42 }
 0x1ca   :  { %v3332_v9 = vmul.f32 %v3326_v24, %v3310_v12 }
 0x1cc   :  { %v3334_v26 = vadd.f32 %v3332_v9, %v3230_v5 }
 0x1cd   :  { %v3330_v39 = vpop.permute.xlu1 %3329 }
 0x1ce   :  { %v3333_v8 = vmul.f32 %v3330_v39, %v3315_v36 }
 0x1d0   :  { %v3335_v49 = vadd.f32 %v3333_v8, %v3231_v23 }
 0x1d2   :  { %v3430_v31 = vpop.permute.xlu1 %3429  ;;  %v4486_v38 = vpop.eup %4485 }
 0x1d3   :  { %v3436_v3 = vmul.f32 %v3430_v31, %v3414_v6  ;;  %v4488_v0 = vpop.eup %4487 }
 0x1d5   :  { %v3438_v30 = vadd.f32 %v3436_v3, %v3334_v26 }
 0x1d6   :  { %v3434_v62 = vpop.permute.xlu1 %3433 }
 0x1d7   :  { %v3462_v37 = vsub.f32 %v3438_v30, %v3460_v35  ;;  %v3437_v34 = vmul.f32 %v3434_v62, %v3419_v60 }
 0x1d9   :  { %v3468_v10 = vmul.f32 %v4486_v38, %v3462_v37  ;;  %v3439_v15 = vadd.f32 %v3437_v34, %v3335_v49 }
 0x1db   :  { %v3463_v45 = vsub.f32 %v3439_v15, %v3461_v54  ;;  %v3472_v46 = vadd.f32 %v3470_v40, %v3468_v10 }
 0x1dd   :  { %v3469_v63 = vmul.f32 %v4488_v0, %v3463_v45  ;;  %3474 = vst [vmem:[#allocation11] sm:$0xff] %v3472_v46 }
 0x1df   :  { %v3473_v51 = vadd.f32 %v3471_v48, %v3469_v63 }
 0x1e1   :  { %3475 = vst [vmem:[#allocation11 + $0x8] sm:$0xff] %v3473_v51 }
 0x1e2   :  { %4613 = shalt.err (!%p4610_p2)
}
 0x1e3   :  { %s4614_s9 = scalar_lea.hbm %s5133_s5, 256 }
 0x1e4   :  { %p4615_p3 = scmp.ne.s32.totalorder %s5133_s5, %s4614_s9  ;;  %p4618_p4 = scmp.lt.u32.totalorder %s4614_s9, %s5133_s5 }
 0x1e6   :  { %p4620_p5 = pnand %p4618_p4, %p4615_p3 }
 0x1e8   :  { %4623 = shalt.err (!%p4620_p5)
}
 0x1e9   :  { %3487 = dma.vmem_to_hbm [thread:$0]  %s3482_s3, 256, %s5133_s5, [#allocation4], %s4634_s30, %s4634_s30, %s4635_s6  }
 0x1ea   :  { %4630 = dma.done.wait [#allocation4], 256  }
 0x1eb   :  { %4631 = vsyncadd [#allocation4], 4294967040 }
 0x1ec   :  { %3491 = vsyncpa [#allocation3], 1 }
 0x1ed   :  { %3492 = vsyncpa [#allocation6], 1 }
 0x1ee   :  { %3493 = vsyncpa [#allocation9], 1 }
 0x1ef   :  { %3494 = vsyncpa [#allocation4], 1 }

</bundles_post_ra>
